<compile_context>
chip_gen: v7x
topology: tpu7x:2x2x1
jax: 0.10.0
libtpu: 0.0.40
codegen_flags: <defaults>
</compile_context>

<pallas_src>
import numpy as np

import jax
import jax.numpy as jnp
from jax.experimental import pallas as pl
from jax.experimental.pallas import tpu as pltpu

# ----------------------------- model geometry ------------------------------
KH = KW = 5
C1, C2 = 10, 20          # conv1 / conv2 output channels
IW1, OW1, PW1 = 30, 26, 13   # conv1: padded width, conv out, pooled (28x28 in)
OW2, PW2 = 11, 5             # conv2: conv out, pooled (floor)
NF = C2 * PW2 * PW2          # 500 flattened features
H1 = 128                     # fc1 width
NCLS, NPAD = 10, 128         # fc2 outputs, padded to 128 lanes


# --------------------------------- kernel ----------------------------------
def cnn_fused_kernel(xc0_ref, xc1_ref, xc2_ref, xc3_ref,
                     w1_ref, tl1_ref, tr1_ref, b1_ref,
                     t2_ref, sh1_ref, sh2_ref, sb_ref,
                     tl2_ref, tr2_ref, b2_ref,
                     sel_ref, w1r_ref, fb1_ref, w2p_ref, fb2_ref,
                     o_ref):
    """Whole CNN forward for TB images (every per-image row block is 8 rows)."""
    bf16 = jnp.bfloat16

    def dot(a, b):
        return jnp.dot(a, b, preferred_element_type=jnp.float32)

    # ---- conv1 (5x5, pad 1): one K=150 banded matmul per output-row phase ----
    # xc{c} holds, per output row i = 4s+c, the 5 padded input rows i..i+4
    # concatenated along K (built on the host from the tiny 28x28 input).
    w1 = w1_ref[...]
    y0 = dot(xc0_ref[...], w1)                 # conv rows 4s      [8*TB, 260]
    y1 = dot(xc1_ref[...], w1)                 # conv rows 4s+1
    y2 = dot(xc2_ref[...], w1)                 # conv rows 4s+2
    y3 = dot(xc3_ref[...], w1)                 # conv rows 4s+3

    # 2x2 max-pool + bias + ReLU.  Row half of the pool = elementwise max of
    # the phase pairs (VPU); column half = exact 0/1 selector matmuls (MXU).
    tl1, tr1, b1 = tl1_ref[...], tr1_ref[...], b1_ref[...]
    ae = jnp.maximum(y0, y1).astype(bf16)      # pre-pool rows 2p (p even)
    ao = jnp.maximum(y2, y3).astype(bf16)      # pre-pool rows 2p (p odd)
    A = jnp.maximum(jnp.maximum(dot(ae, tl1), dot(ae, tr1)) + b1, 0.0).astype(bf16)
    B = jnp.maximum(jnp.maximum(dot(ao, tl1), dot(ao, tr1)) + b1, 0.0).astype(bf16)
    # A: even rows of a1 (7 valid / image-block), B: odd rows (6 valid).

    # ---- conv2 (5x5, pad 1) on the polyphase streams --------------------------
    # Vertical taps need rows r+1 / r+2 / r-1 inside each 8-row image block;
    # these are exact 0/1 shift-selector matmuls (padding row r-1<0 -> zero).
    A1 = dot(sh1_ref[...], A).astype(bf16)     # A[r+1]
    A2 = dot(sh2_ref[...], A).astype(bf16)     # A[r+2]
    B1 = dot(sh1_ref[...], B).astype(bf16)     # B[r+1]
    Z = dot(sb_ref[...], B).astype(bf16)       # B[r-1], zero at r == 0 (top pad)

    ev = (dot(Z, t2_ref[0]) + dot(A, t2_ref[1]) + dot(B, t2_ref[2])
          + dot(A1, t2_ref[3]) + dot(B1, t2_ref[4]))          # conv2 rows 2r
    od = (dot(A, t2_ref[0]) + dot(B, t2_ref[1]) + dot(A1, t2_ref[2])
          + dot(B1, t2_ref[3]) + dot(A2, t2_ref[4]))          # conv2 rows 2r+1
    # TODO(synk): nn.Dropout2d() is identity under model.eval(); training-mode
    # parity would mask whole channels with pltpu.prng_random_bits here.
    m2 = jnp.maximum(ev, od).astype(bf16)                      # row half of pool
    a2 = jnp.maximum(
        jnp.maximum(dot(m2, tl2_ref[...]), dot(m2, tr2_ref[...])) + b2_ref[...],
        0.0).astype(bf16)                                      # [8*TB, 100]

    # ---- fc1 + ReLU + fc2 (rows gathered per image with 0/1 selectors) -------
    h = dot(dot(sel_ref[0], a2).astype(bf16), w1r_ref[0])
    for r in range(1, PW2):
        h = h + dot(dot(sel_ref[r], a2).astype(bf16), w1r_ref[r])
    h = jnp.maximum(h + fb1_ref[...], 0.0).astype(bf16)
    # TODO(synk): nn.Dropout(0.1) is identity under model.eval().
    o_ref[0] = dot(h, w2p_ref[...]) + fb2_ref[...]             # [TB, 128]


# --------------------- host-side constant construction ---------------------
def _toeplitz(w, in_cols, col_off):
    """Per-tap column-Toeplitz weights for channels-last [rows, W*Cin] slabs.

    t[u, m*cin+ci, j*cout+co] = w[co, ci, u, (m + col_off) - j] when the kw
    index is in [0, KW).  col_off > 0 folds the spatial column padding in.
    """
    cout, cin, kh, kw = w.shape
    out_cols = in_cols + 2 * col_off - (kw - 1)
    t = np.zeros((kh, in_cols * cin, out_cols * cout), np.float32)
    for u in range(kh):
        for j in range(out_cols):
            for v in range(kw):
                m = j + v - col_off
                if 0 <= m < in_cols:
                    t[u, m * cin:(m + 1) * cin, j * cout:(j + 1) * cout] = w[:, :, u, v].T
    return t


def _colpool(out_cols, c):
    """0/1 selectors implementing the column half of a 2x2/stride-2 max-pool."""
    pw = out_cols // 2
    tl = np.zeros((out_cols * c, pw * c), np.float32)
    tr = np.zeros_like(tl)
    for j in range(pw):
        for cc in range(c):
            tl[(2 * j) * c + cc, j * c + cc] = 1.0
            tr[(2 * j + 1) * c + cc, j * c + cc] = 1.0
    return tl, tr


def prepare_params(p):
    """Convert PyTorch-layout parameters into the kernel-side constant set."""
    w1 = np.asarray(p["conv1_w"], np.float32)   # [10, 1, 5, 5]
    b1 = np.asarray(p["conv1_b"], np.float32)
    w2 = np.asarray(p["conv2_w"], np.float32)   # [20, 10, 5, 5]
    b2 = np.asarray(p["conv2_b"], np.float32)
    fc1_w = np.asarray(p["fc1_w"], np.float32)  # [128, 500]
    fc1_b = np.asarray(p["fc1_b"], np.float32)
    fc2_w = np.asarray(p["fc2_w"], np.float32)  # [10, 128]
    fc2_b = np.asarray(p["fc2_b"], np.float32)

    w1cat = _toeplitz(w1, IW1, 0).reshape(KH * IW1, OW1 * C1)   # [150, 260]
    tl1, tr1 = _colpool(OW1, C1)                                # [260, 130]
    t2 = _toeplitz(w2, PW1, 1)                                  # [5, 130, 220]
    tl2, tr2 = _colpool(OW2, C2)                                # [220, 100]

    # fc1: reorder the 500 inputs from PyTorch (c,h,w) order to our (h, w*C+c)
    # layout, split per pooled row h.
    w1r = fc1_w.reshape(H1, C2, PW2, PW2).transpose(2, 3, 1, 0).reshape(PW2, PW2 * C2, H1)

    w2p = np.zeros((H1, NPAD), np.float32)
    w2p[:, :NCLS] = fc2_w.T
    fb2 = np.zeros((1, NPAD), np.float32)
    fb2[0, :NCLS] = fc2_b

    bf = jnp.bfloat16
    return dict(
        w1cat=jnp.asarray(w1cat, bf), tl1=jnp.asarray(tl1, bf), tr1=jnp.asarray(tr1, bf),
        b1=jnp.asarray(np.tile(b1, PW1)[None, :], jnp.float32),
        t2=jnp.asarray(t2, bf), tl2=jnp.asarray(tl2, bf), tr2=jnp.asarray(tr2, bf),
        b2=jnp.asarray(np.tile(b2, PW2)[None, :], jnp.float32),
        w1r=jnp.asarray(w1r, bf), fb1=jnp.asarray(fc1_b[None, :], jnp.float32),
        w2p=jnp.asarray(w2p, bf), fb2=jnp.asarray(fb2, jnp.float32),
    )


# ------------------------------ forward pass --------------------------------
@jax.jit
def cnn_forward_pallas(x, prep):
    bsz = x.shape[0]
    tb = max(1, min(16, (bsz + 1) // 2))      # keep grid >= 2 whenever bsz >= 2
    n_blk = -(-bsz // tb)
    bpad = n_blk * tb
    m8 = tb * 8                               # stacked rows per grid step

    # conv1 operands: pad (1,7) rows / (1,1) cols, then for each output-row
    # phase c concatenate padded rows c..c+4 (step 4) along K (row im2col of
    # the tiny input only; activations are never im2col'd).
    xp = jnp.pad(x[:, 0, :, :], ((0, bpad - bsz), (1, 7), (1, 1)))
    xcs = [jnp.concatenate([xp[:, c + u::4, :][:, :8, :] for u in range(KH)],
                           axis=-1).reshape(bpad * 8, KH * IW1).astype(jnp.bfloat16)
           for c in range(4)]

    # TB-dependent 0/1 selectors: in-block row shifts (conv2 vertical taps /
    # padding row) and per-image valid-row gather for fc1.
    sh1 = np.zeros((m8, m8), np.float32)
    sh1[np.arange(m8 - 1), np.arange(1, m8)] = 1.0
    sh2 = np.zeros((m8, m8), np.float32)
    sh2[np.arange(m8 - 2), np.arange(2, m8)] = 1.0
    sb = np.zeros((m8, m8), np.float32)
    g = np.arange(1, m8)
    g = g[g % 8 != 0]
    sb[g, g - 1] = 1.0
    sel = np.zeros((PW2, tb, m8), np.float32)
    for r in range(PW2):
        sel[r, np.arange(tb), np.arange(tb) * 8 + r] = 1.0
    bf = jnp.bfloat16
    sh1, sh2, sb, sel = (jnp.asarray(a, bf) for a in (sh1, sh2, sb, sel))

    xspec = pl.BlockSpec((m8, KH * IW1), lambda i: (i, 0))
    c2d = lambda i: (0, 0)
    c3d = lambda i: (0, 0, 0)

    out = pl.pallas_call(
        cnn_fused_kernel,
        out_shape=jax.ShapeDtypeStruct((n_blk, tb, NPAD), jnp.float32),
        grid=(n_blk,),
        in_specs=[
            xspec, xspec, xspec, xspec,
            pl.BlockSpec((KH * IW1, OW1 * C1), c2d),      # w1cat
            pl.BlockSpec((OW1 * C1, PW1 * C1), c2d),      # tl1
            pl.BlockSpec((OW1 * C1, PW1 * C1), c2d),      # tr1
            pl.BlockSpec((1, PW1 * C1), c2d),             # b1
            pl.BlockSpec((KH, PW1 * C1, OW2 * C2), c3d),  # t2
            pl.BlockSpec((m8, m8), c2d),                  # sh1
            pl.BlockSpec((m8, m8), c2d),                  # sh2
            pl.BlockSpec((m8, m8), c2d),                  # sb
            pl.BlockSpec((OW2 * C2, PW2 * C2), c2d),      # tl2
            pl.BlockSpec((OW2 * C2, PW2 * C2), c2d),      # tr2
            pl.BlockSpec((1, PW2 * C2), c2d),             # b2
            pl.BlockSpec((PW2, tb, m8), c3d),             # sel
            pl.BlockSpec((PW2, PW2 * C2, H1), c3d),       # w1r
            pl.BlockSpec((1, H1), c2d),                   # fb1
            pl.BlockSpec((H1, NPAD), c2d),                # w2p
            pl.BlockSpec((1, NPAD), c2d),                 # fb2
        ],
        out_specs=pl.BlockSpec((1, tb, NPAD), lambda i: (i, 0, 0)),
        compiler_params=pltpu.CompilerParams(
            dimension_semantics=("parallel",),
            vmem_limit_bytes=32 * 1024 * 1024),
    )(xcs[0], xcs[1], xcs[2], xcs[3],
      prep["w1cat"], prep["tl1"], prep["tr1"], prep["b1"],
      prep["t2"], sh1, sh2, sb,
      prep["tl2"], prep["tr2"], prep["b2"],
      sel, prep["w1r"], prep["fb1"], prep["w2p"], prep["fb2"])

    return out.reshape(bpad, NPAD)[:bsz, :NCLS]


# --------------------------- pure-JAX reference ------------------------------
def reference_forward(x, p):
    hi = jax.lax.Precision.HIGHEST

    def conv(z, w, b):
        y = jax.lax.conv_general_dilated(
            z, w, (1, 1), [(1, 1), (1, 1)],
            dimension_numbers=("NCHW", "OIHW", "NCHW"), precision=hi)
        return y + b[None, :, None, None]

    def pool(z):                       # 2x2/stride-2 max-pool, floor semantics
        h, w = (z.shape[2] // 2) * 2, (z.shape[3] // 2) * 2
        z = z[:, :, :h, :w]
        return jnp.maximum(jnp.maximum(z[:, :, 0::2, 0::2], z[:, :, 0::2, 1::2]),
                           jnp.maximum(z[:, :, 1::2, 0::2], z[:, :, 1::2, 1::2]))

    h = jax.nn.relu(pool(conv(x, p["conv1_w"], p["conv1_b"])))
    h = jax.nn.relu(pool(conv(h, p["conv2_w"], p["conv2_b"])))   # dropout2d = id
    h = h.reshape(h.shape[0], -1)
    h = jax.nn.relu(jnp.dot(h, p["fc1_w"].T, precision=hi) + p["fc1_b"])
    return jnp.dot(h, p["fc2_w"].T, precision=hi) + p["fc2_b"]   # dropout = id


# ---------------------------------- main -------------------------------------
if __name__ == "__main__":
    key = jax.random.PRNGKey(0)
    ks = jax.random.split(key, 9)

    def uinit(k, shape, fan_in):
        bound = 1.0 / float(np.sqrt(fan_in))
        return jax.random.uniform(k, shape, jnp.float32, -bound, bound)

    params = {
        "conv1_w": uinit(ks[0], (C1, 1, KH, KW), 1 * KH * KW),
        "conv1_b": uinit(ks[1], (C1,), 1 * KH * KW),
        "conv2_w": uinit(ks[2], (C2, C1, KH, KW), C1 * KH * KW),
        "conv2_b": uinit(ks[3], (C2,), C1 * KH * KW),
        "fc1_w": uinit(ks[4], (H1, NF), NF),
        "fc1_b": uinit(ks[5], (H1,), NF),
        "fc2_w": uinit(ks[6], (NCLS, H1), H1),
        "fc2_b": uinit(ks[7], (NCLS,), H1),
    }
    x = jax.random.normal(ks[8], (2, 1, 28, 28), jnp.float32)

    prep = prepare_params(params)
    out = jax.block_until_ready(cnn_forward_pallas(x, prep))
    assert out.shape == (2, NCLS), out.shape

    ref = jax.block_until_ready(reference_forward(x, params))
    err = float(jnp.max(jnp.abs(out - ref)))
    # bf16 MXU operands with f32 accumulation -> bf16-level tolerance vs f32 ref.
    if not np.allclose(np.asarray(out), np.asarray(ref), rtol=2e-2, atol=2e-2):
        raise AssertionError(f"Pallas CNN output mismatch vs reference "
                             f"(max abs err {err:.3e})")
    print("KERNEL_OK")
</pallas_src>

<mosaic_0001>
module attributes {stable_mosaic.version = 11 : i64} {
  func.func @cnn_fused_kernel(%arg0: i32, %arg1: memref<8x150xbf16, #tpu.memory_space<vmem>>, %arg2: memref<8x150xbf16, #tpu.memory_space<vmem>>, %arg3: memref<8x150xbf16, #tpu.memory_space<vmem>>, %arg4: memref<8x150xbf16, #tpu.memory_space<vmem>>, %arg5: memref<150x260xbf16, #tpu.memory_space<vmem>>, %arg6: memref<260x130xbf16, #tpu.memory_space<vmem>>, %arg7: memref<260x130xbf16, #tpu.memory_space<vmem>>, %arg8: memref<1x130xf32, #tpu.memory_space<vmem>>, %arg9: memref<5x130x220xbf16, #tpu.memory_space<vmem>>, %arg10: memref<8x8xbf16, #tpu.memory_space<vmem>>, %arg11: memref<8x8xbf16, #tpu.memory_space<vmem>>, %arg12: memref<8x8xbf16, #tpu.memory_space<vmem>>, %arg13: memref<220x100xbf16, #tpu.memory_space<vmem>>, %arg14: memref<220x100xbf16, #tpu.memory_space<vmem>>, %arg15: memref<1x100xf32, #tpu.memory_space<vmem>>, %arg16: memref<5x1x8xbf16, #tpu.memory_space<vmem>>, %arg17: memref<5x100x128xbf16, #tpu.memory_space<vmem>>, %arg18: memref<1x128xf32, #tpu.memory_space<vmem>>, %arg19: memref<128x128xbf16, #tpu.memory_space<vmem>>, %arg20: memref<1x128xf32, #tpu.memory_space<vmem>>, %arg21: memref<1x1x128xf32, #tpu.memory_space<vmem>>) attributes {dimension_semantics = [#tpu.dimension_semantics<parallel>], iteration_bounds = array<i64: 2>, scalar_prefetch = 0 : i64, scratch_operands = 0 : i64, tpu.core_type = #tpu.core_type<tc>, window_params = [{transform_indices = @transform_0, window_bounds = array<i64: 8, 150>}, {transform_indices = @transform_1, window_bounds = array<i64: 8, 150>}, {transform_indices = @transform_2, window_bounds = array<i64: 8, 150>}, {transform_indices = @transform_3, window_bounds = array<i64: 8, 150>}, {pipeline_mode = #tpu.pipeline_mode<synchronous>, transform_indices = @transform_4, window_bounds = array<i64: 150, 260>}, {pipeline_mode = #tpu.pipeline_mode<synchronous>, transform_indices = @transform_5, window_bounds = array<i64: 260, 130>}, {pipeline_mode = #tpu.pipeline_mode<synchronous>, transform_indices = @transform_6, window_bounds = array<i64: 260, 130>}, {pipeline_mode = #tpu.pipeline_mode<synchronous>, transform_indices = @transform_7, window_bounds = array<i64: 1, 130>}, {pipeline_mode = #tpu.pipeline_mode<synchronous>, transform_indices = @transform_8, window_bounds = array<i64: 5, 130, 220>}, {pipeline_mode = #tpu.pipeline_mode<synchronous>, transform_indices = @transform_9, window_bounds = array<i64: 8, 8>}, {pipeline_mode = #tpu.pipeline_mode<synchronous>, transform_indices = @transform_10, window_bounds = array<i64: 8, 8>}, {pipeline_mode = #tpu.pipeline_mode<synchronous>, transform_indices = @transform_11, window_bounds = array<i64: 8, 8>}, {pipeline_mode = #tpu.pipeline_mode<synchronous>, transform_indices = @transform_12, window_bounds = array<i64: 220, 100>}, {pipeline_mode = #tpu.pipeline_mode<synchronous>, transform_indices = @transform_13, window_bounds = array<i64: 220, 100>}, {pipeline_mode = #tpu.pipeline_mode<synchronous>, transform_indices = @transform_14, window_bounds = array<i64: 1, 100>}, {pipeline_mode = #tpu.pipeline_mode<synchronous>, transform_indices = @transform_15, window_bounds = array<i64: 5, 1, 8>}, {pipeline_mode = #tpu.pipeline_mode<synchronous>, transform_indices = @transform_16, window_bounds = array<i64: 5, 100, 128>}, {pipeline_mode = #tpu.pipeline_mode<synchronous>, transform_indices = @transform_17, window_bounds = array<i64: 1, 128>}, {pipeline_mode = #tpu.pipeline_mode<synchronous>, transform_indices = @transform_18, window_bounds = array<i64: 128, 128>}, {pipeline_mode = #tpu.pipeline_mode<synchronous>, transform_indices = @transform_19, window_bounds = array<i64: 1, 128>}, {transform_indices = @transform_20, window_bounds = array<i64: 1, 1, 128>}]} {
    %c0 = arith.constant 0 : index
    %c0_0 = arith.constant 0 : index
    %0 = vector.load %arg5[%c0, %c0_0] : memref<150x260xbf16, #tpu.memory_space<vmem>>, vector<150x260xbf16>
    %c0_1 = arith.constant 0 : index
    %c0_2 = arith.constant 0 : index
    %1 = vector.load %arg1[%c0_1, %c0_2] : memref<8x150xbf16, #tpu.memory_space<vmem>>, vector<8x150xbf16>
    %cst = arith.constant dense<0.000000e+00> : vector<8x260xf32>
    %2 = tpu.matmul %1, %0, %cst {dimension_numbers = #tpu.dot_dimension_numbers<[1], [0], [0], [1], [0, 0, 1, 1], [], []>} : vector<8x150xbf16>, vector<150x260xbf16>, vector<8x260xf32> -> vector<8x260xf32>
    %c0_3 = arith.constant 0 : index
    %c0_4 = arith.constant 0 : index
    %3 = vector.load %arg2[%c0_3, %c0_4] : memref<8x150xbf16, #tpu.memory_space<vmem>>, vector<8x150xbf16>
    %cst_5 = arith.constant dense<0.000000e+00> : vector<8x260xf32>
    %4 = tpu.matmul %3, %0, %cst_5 {dimension_numbers = #tpu.dot_dimension_numbers<[1], [0], [0], [1], [0, 0, 1, 1], [], []>} : vector<8x150xbf16>, vector<150x260xbf16>, vector<8x260xf32> -> vector<8x260xf32>
    %c0_6 = arith.constant 0 : index
    %c0_7 = arith.constant 0 : index
    %5 = vector.load %arg3[%c0_6, %c0_7] : memref<8x150xbf16, #tpu.memory_space<vmem>>, vector<8x150xbf16>
    %cst_8 = arith.constant dense<0.000000e+00> : vector<8x260xf32>
    %6 = tpu.matmul %5, %0, %cst_8 {dimension_numbers = #tpu.dot_dimension_numbers<[1], [0], [0], [1], [0, 0, 1, 1], [], []>} : vector<8x150xbf16>, vector<150x260xbf16>, vector<8x260xf32> -> vector<8x260xf32>
    %c0_9 = arith.constant 0 : index
    %c0_10 = arith.constant 0 : index
    %7 = vector.load %arg4[%c0_9, %c0_10] : memref<8x150xbf16, #tpu.memory_space<vmem>>, vector<8x150xbf16>
    %cst_11 = arith.constant dense<0.000000e+00> : vector<8x260xf32>
    %8 = tpu.matmul %7, %0, %cst_11 {dimension_numbers = #tpu.dot_dimension_numbers<[1], [0], [0], [1], [0, 0, 1, 1], [], []>} : vector<8x150xbf16>, vector<150x260xbf16>, vector<8x260xf32> -> vector<8x260xf32>
    %c0_12 = arith.constant 0 : index
    %c0_13 = arith.constant 0 : index
    %9 = vector.load %arg6[%c0_12, %c0_13] : memref<260x130xbf16, #tpu.memory_space<vmem>>, vector<260x130xbf16>
    %c0_14 = arith.constant 0 : index
    %c0_15 = arith.constant 0 : index
    %10 = vector.load %arg7[%c0_14, %c0_15] : memref<260x130xbf16, #tpu.memory_space<vmem>>, vector<260x130xbf16>
    %c0_16 = arith.constant 0 : index
    %c0_17 = arith.constant 0 : index
    %11 = vector.load %arg8[%c0_16, %c0_17] : memref<1x130xf32, #tpu.memory_space<vmem>>, vector<1x130xf32>
    %12 = arith.maximumf %2, %4 : vector<8x260xf32>
    %13 = arith.truncf %12 : vector<8x260xf32> to vector<8x260xbf16>
    %14 = arith.maximumf %6, %8 : vector<8x260xf32>
    %15 = arith.truncf %14 : vector<8x260xf32> to vector<8x260xbf16>
    %cst_18 = arith.constant dense<0.000000e+00> : vector<8x130xf32>
    %16 = tpu.matmul %13, %9, %cst_18 {dimension_numbers = #tpu.dot_dimension_numbers<[1], [0], [0], [1], [0, 0, 1, 1], [], []>} : vector<8x260xbf16>, vector<260x130xbf16>, vector<8x130xf32> -> vector<8x130xf32>
    %cst_19 = arith.constant dense<0.000000e+00> : vector<8x130xf32>
    %17 = tpu.matmul %13, %10, %cst_19 {dimension_numbers = #tpu.dot_dimension_numbers<[1], [0], [0], [1], [0, 0, 1, 1], [], []>} : vector<8x260xbf16>, vector<260x130xbf16>, vector<8x130xf32> -> vector<8x130xf32>
    %18 = arith.maximumf %16, %17 : vector<8x130xf32>
    %19 = vector.broadcast %11 : vector<1x130xf32> to vector<8x130xf32>
    %20 = arith.addf %18, %19 : vector<8x130xf32>
    %cst_20 = arith.constant 0.000000e+00 : f32
    %21 = vector.broadcast %cst_20 : f32 to vector<8x130xf32>
    %22 = arith.maximumf %20, %21 : vector<8x130xf32>
    %23 = arith.truncf %22 : vector<8x130xf32> to vector<8x130xbf16>
    %cst_21 = arith.constant dense<0.000000e+00> : vector<8x130xf32>
    %24 = tpu.matmul %15, %9, %cst_21 {dimension_numbers = #tpu.dot_dimension_numbers<[1], [0], [0], [1], [0, 0, 1, 1], [], []>} : vector<8x260xbf16>, vector<260x130xbf16>, vector<8x130xf32> -> vector<8x130xf32>
    %cst_22 = arith.constant dense<0.000000e+00> : vector<8x130xf32>
    %25 = tpu.matmul %15, %10, %cst_22 {dimension_numbers = #tpu.dot_dimension_numbers<[1], [0], [0], [1], [0, 0, 1, 1], [], []>} : vector<8x260xbf16>, vector<260x130xbf16>, vector<8x130xf32> -> vector<8x130xf32>
    %26 = arith.maximumf %24, %25 : vector<8x130xf32>
    %27 = vector.broadcast %11 : vector<1x130xf32> to vector<8x130xf32>
    %28 = arith.addf %26, %27 : vector<8x130xf32>
    %cst_23 = arith.constant 0.000000e+00 : f32
    %29 = vector.broadcast %cst_23 : f32 to vector<8x130xf32>
    %30 = arith.maximumf %28, %29 : vector<8x130xf32>
    %31 = arith.truncf %30 : vector<8x130xf32> to vector<8x130xbf16>
    %c0_24 = arith.constant 0 : index
    %c0_25 = arith.constant 0 : index
    %32 = vector.load %arg10[%c0_24, %c0_25] : memref<8x8xbf16, #tpu.memory_space<vmem>>, vector<8x8xbf16>
    %cst_26 = arith.constant dense<0.000000e+00> : vector<8x130xf32>
    %33 = tpu.matmul %32, %23, %cst_26 {dimension_numbers = #tpu.dot_dimension_numbers<[1], [0], [0], [1], [0, 0, 1, 1], [], []>} : vector<8x8xbf16>, vector<8x130xbf16>, vector<8x130xf32> -> vector<8x130xf32>
    %34 = arith.truncf %33 : vector<8x130xf32> to vector<8x130xbf16>
    %c0_27 = arith.constant 0 : index
    %c0_28 = arith.constant 0 : index
    %35 = vector.load %arg11[%c0_27, %c0_28] : memref<8x8xbf16, #tpu.memory_space<vmem>>, vector<8x8xbf16>
    %cst_29 = arith.constant dense<0.000000e+00> : vector<8x130xf32>
    %36 = tpu.matmul %35, %23, %cst_29 {dimension_numbers = #tpu.dot_dimension_numbers<[1], [0], [0], [1], [0, 0, 1, 1], [], []>} : vector<8x8xbf16>, vector<8x130xbf16>, vector<8x130xf32> -> vector<8x130xf32>
    %37 = arith.truncf %36 : vector<8x130xf32> to vector<8x130xbf16>
    %c0_30 = arith.constant 0 : index
    %c0_31 = arith.constant 0 : index
    %38 = vector.load %arg10[%c0_30, %c0_31] : memref<8x8xbf16, #tpu.memory_space<vmem>>, vector<8x8xbf16>
    %cst_32 = arith.constant dense<0.000000e+00> : vector<8x130xf32>
    %39 = tpu.matmul %38, %31, %cst_32 {dimension_numbers = #tpu.dot_dimension_numbers<[1], [0], [0], [1], [0, 0, 1, 1], [], []>} : vector<8x8xbf16>, vector<8x130xbf16>, vector<8x130xf32> -> vector<8x130xf32>
    %40 = arith.truncf %39 : vector<8x130xf32> to vector<8x130xbf16>
    %c0_33 = arith.constant 0 : index
    %c0_34 = arith.constant 0 : index
    %41 = vector.load %arg12[%c0_33, %c0_34] : memref<8x8xbf16, #tpu.memory_space<vmem>>, vector<8x8xbf16>
    %cst_35 = arith.constant dense<0.000000e+00> : vector<8x130xf32>
    %42 = tpu.matmul %41, %31, %cst_35 {dimension_numbers = #tpu.dot_dimension_numbers<[1], [0], [0], [1], [0, 0, 1, 1], [], []>} : vector<8x8xbf16>, vector<8x130xbf16>, vector<8x130xf32> -> vector<8x130xf32>
    %43 = arith.truncf %42 : vector<8x130xf32> to vector<8x130xbf16>
    %c0_36 = arith.constant 0 : index
    %c0_37 = arith.constant 0 : index
    %c0_38 = arith.constant 0 : index
    %44 = vector.load %arg9[%c0_36, %c0_37, %c0_38] : memref<5x130x220xbf16, #tpu.memory_space<vmem>>, vector<1x130x220xbf16>
    %45 = vector.shape_cast %44 : vector<1x130x220xbf16> to vector<130x220xbf16>
    %cst_39 = arith.constant dense<0.000000e+00> : vector<8x220xf32>
    %46 = tpu.matmul %43, %45, %cst_39 {dimension_numbers = #tpu.dot_dimension_numbers<[1], [0], [0], [1], [0, 0, 1, 1], [], []>} : vector<8x130xbf16>, vector<130x220xbf16>, vector<8x220xf32> -> vector<8x220xf32>
    %c1 = arith.constant 1 : index
    %c0_40 = arith.constant 0 : index
    %c0_41 = arith.constant 0 : index
    %47 = vector.load %arg9[%c1, %c0_40, %c0_41] : memref<5x130x220xbf16, #tpu.memory_space<vmem>>, vector<1x130x220xbf16>
    %48 = vector.shape_cast %47 : vector<1x130x220xbf16> to vector<130x220xbf16>
    %cst_42 = arith.constant dense<0.000000e+00> : vector<8x220xf32>
    %49 = tpu.matmul %23, %48, %cst_42 {dimension_numbers = #tpu.dot_dimension_numbers<[1], [0], [0], [1], [0, 0, 1, 1], [], []>} : vector<8x130xbf16>, vector<130x220xbf16>, vector<8x220xf32> -> vector<8x220xf32>
    %50 = arith.addf %46, %49 : vector<8x220xf32>
    %c2 = arith.constant 2 : index
    %c0_43 = arith.constant 0 : index
    %c0_44 = arith.constant 0 : index
    %51 = vector.load %arg9[%c2, %c0_43, %c0_44] : memref<5x130x220xbf16, #tpu.memory_space<vmem>>, vector<1x130x220xbf16>
    %52 = vector.shape_cast %51 : vector<1x130x220xbf16> to vector<130x220xbf16>
    %cst_45 = arith.constant dense<0.000000e+00> : vector<8x220xf32>
    %53 = tpu.matmul %31, %52, %cst_45 {dimension_numbers = #tpu.dot_dimension_numbers<[1], [0], [0], [1], [0, 0, 1, 1], [], []>} : vector<8x130xbf16>, vector<130x220xbf16>, vector<8x220xf32> -> vector<8x220xf32>
    %54 = arith.addf %50, %53 : vector<8x220xf32>
    %c3 = arith.constant 3 : index
    %c0_46 = arith.constant 0 : index
    %c0_47 = arith.constant 0 : index
    %55 = vector.load %arg9[%c3, %c0_46, %c0_47] : memref<5x130x220xbf16, #tpu.memory_space<vmem>>, vector<1x130x220xbf16>
    %56 = vector.shape_cast %55 : vector<1x130x220xbf16> to vector<130x220xbf16>
    %cst_48 = arith.constant dense<0.000000e+00> : vector<8x220xf32>
    %57 = tpu.matmul %34, %56, %cst_48 {dimension_numbers = #tpu.dot_dimension_numbers<[1], [0], [0], [1], [0, 0, 1, 1], [], []>} : vector<8x130xbf16>, vector<130x220xbf16>, vector<8x220xf32> -> vector<8x220xf32>
    %58 = arith.addf %54, %57 : vector<8x220xf32>
    %c4 = arith.constant 4 : index
    %c0_49 = arith.constant 0 : index
    %c0_50 = arith.constant 0 : index
    %59 = vector.load %arg9[%c4, %c0_49, %c0_50] : memref<5x130x220xbf16, #tpu.memory_space<vmem>>, vector<1x130x220xbf16>
    %60 = vector.shape_cast %59 : vector<1x130x220xbf16> to vector<130x220xbf16>
    %cst_51 = arith.constant dense<0.000000e+00> : vector<8x220xf32>
    %61 = tpu.matmul %40, %60, %cst_51 {dimension_numbers = #tpu.dot_dimension_numbers<[1], [0], [0], [1], [0, 0, 1, 1], [], []>} : vector<8x130xbf16>, vector<130x220xbf16>, vector<8x220xf32> -> vector<8x220xf32>
    %62 = arith.addf %58, %61 : vector<8x220xf32>
    %c0_52 = arith.constant 0 : index
    %c0_53 = arith.constant 0 : index
    %c0_54 = arith.constant 0 : index
    %63 = vector.load %arg9[%c0_52, %c0_53, %c0_54] : memref<5x130x220xbf16, #tpu.memory_space<vmem>>, vector<1x130x220xbf16>
    %64 = vector.shape_cast %63 : vector<1x130x220xbf16> to vector<130x220xbf16>
    %cst_55 = arith.constant dense<0.000000e+00> : vector<8x220xf32>
    %65 = tpu.matmul %23, %64, %cst_55 {dimension_numbers = #tpu.dot_dimension_numbers<[1], [0], [0], [1], [0, 0, 1, 1], [], []>} : vector<8x130xbf16>, vector<130x220xbf16>, vector<8x220xf32> -> vector<8x220xf32>
    %c1_56 = arith.constant 1 : index
    %c0_57 = arith.constant 0 : index
    %c0_58 = arith.constant 0 : index
    %66 = vector.load %arg9[%c1_56, %c0_57, %c0_58] : memref<5x130x220xbf16, #tpu.memory_space<vmem>>, vector<1x130x220xbf16>
    %67 = vector.shape_cast %66 : vector<1x130x220xbf16> to vector<130x220xbf16>
    %cst_59 = arith.constant dense<0.000000e+00> : vector<8x220xf32>
    %68 = tpu.matmul %31, %67, %cst_59 {dimension_numbers = #tpu.dot_dimension_numbers<[1], [0], [0], [1], [0, 0, 1, 1], [], []>} : vector<8x130xbf16>, vector<130x220xbf16>, vector<8x220xf32> -> vector<8x220xf32>
    %69 = arith.addf %65, %68 : vector<8x220xf32>
    %c2_60 = arith.constant 2 : index
    %c0_61 = arith.constant 0 : index
    %c0_62 = arith.constant 0 : index
    %70 = vector.load %arg9[%c2_60, %c0_61, %c0_62] : memref<5x130x220xbf16, #tpu.memory_space<vmem>>, vector<1x130x220xbf16>
    %71 = vector.shape_cast %70 : vector<1x130x220xbf16> to vector<130x220xbf16>
    %cst_63 = arith.constant dense<0.000000e+00> : vector<8x220xf32>
    %72 = tpu.matmul %34, %71, %cst_63 {dimension_numbers = #tpu.dot_dimension_numbers<[1], [0], [0], [1], [0, 0, 1, 1], [], []>} : vector<8x130xbf16>, vector<130x220xbf16>, vector<8x220xf32> -> vector<8x220xf32>
    %73 = arith.addf %69, %72 : vector<8x220xf32>
    %c3_64 = arith.constant 3 : index
    %c0_65 = arith.constant 0 : index
    %c0_66 = arith.constant 0 : index
    %74 = vector.load %arg9[%c3_64, %c0_65, %c0_66] : memref<5x130x220xbf16, #tpu.memory_space<vmem>>, vector<1x130x220xbf16>
    %75 = vector.shape_cast %74 : vector<1x130x220xbf16> to vector<130x220xbf16>
    %cst_67 = arith.constant dense<0.000000e+00> : vector<8x220xf32>
    %76 = tpu.matmul %40, %75, %cst_67 {dimension_numbers = #tpu.dot_dimension_numbers<[1], [0], [0], [1], [0, 0, 1, 1], [], []>} : vector<8x130xbf16>, vector<130x220xbf16>, vector<8x220xf32> -> vector<8x220xf32>
    %77 = arith.addf %73, %76 : vector<8x220xf32>
    %c4_68 = arith.constant 4 : index
    %c0_69 = arith.constant 0 : index
    %c0_70 = arith.constant 0 : index
    %78 = vector.load %arg9[%c4_68, %c0_69, %c0_70] : memref<5x130x220xbf16, #tpu.memory_space<vmem>>, vector<1x130x220xbf16>
    %79 = vector.shape_cast %78 : vector<1x130x220xbf16> to vector<130x220xbf16>
    %cst_71 = arith.constant dense<0.000000e+00> : vector<8x220xf32>
    %80 = tpu.matmul %37, %79, %cst_71 {dimension_numbers = #tpu.dot_dimension_numbers<[1], [0], [0], [1], [0, 0, 1, 1], [], []>} : vector<8x130xbf16>, vector<130x220xbf16>, vector<8x220xf32> -> vector<8x220xf32>
    %81 = arith.addf %77, %80 : vector<8x220xf32>
    %82 = arith.maximumf %62, %81 : vector<8x220xf32>
    %83 = arith.truncf %82 : vector<8x220xf32> to vector<8x220xbf16>
    %c0_72 = arith.constant 0 : index
    %c0_73 = arith.constant 0 : index
    %84 = vector.load %arg13[%c0_72, %c0_73] : memref<220x100xbf16, #tpu.memory_space<vmem>>, vector<220x100xbf16>
    %cst_74 = arith.constant dense<0.000000e+00> : vector<8x100xf32>
    %85 = tpu.matmul %83, %84, %cst_74 {dimension_numbers = #tpu.dot_dimension_numbers<[1], [0], [0], [1], [0, 0, 1, 1], [], []>} : vector<8x220xbf16>, vector<220x100xbf16>, vector<8x100xf32> -> vector<8x100xf32>
    %c0_75 = arith.constant 0 : index
    %c0_76 = arith.constant 0 : index
    %86 = vector.load %arg14[%c0_75, %c0_76] : memref<220x100xbf16, #tpu.memory_space<vmem>>, vector<220x100xbf16>
    %cst_77 = arith.constant dense<0.000000e+00> : vector<8x100xf32>
    %87 = tpu.matmul %83, %86, %cst_77 {dimension_numbers = #tpu.dot_dimension_numbers<[1], [0], [0], [1], [0, 0, 1, 1], [], []>} : vector<8x220xbf16>, vector<220x100xbf16>, vector<8x100xf32> -> vector<8x100xf32>
    %88 = arith.maximumf %85, %87 : vector<8x100xf32>
    %c0_78 = arith.constant 0 : index
    %c0_79 = arith.constant 0 : index
    %89 = vector.load %arg15[%c0_78, %c0_79] : memref<1x100xf32, #tpu.memory_space<vmem>>, vector<1x100xf32>
    %90 = vector.broadcast %89 : vector<1x100xf32> to vector<8x100xf32>
    %91 = arith.addf %88, %90 : vector<8x100xf32>
    %cst_80 = arith.constant 0.000000e+00 : f32
    %92 = vector.broadcast %cst_80 : f32 to vector<8x100xf32>
    %93 = arith.maximumf %91, %92 : vector<8x100xf32>
    %94 = arith.truncf %93 : vector<8x100xf32> to vector<8x100xbf16>
    %c0_81 = arith.constant 0 : index
    %c0_82 = arith.constant 0 : index
    %c0_83 = arith.constant 0 : index
    %95 = vector.load %arg16[%c0_81, %c0_82, %c0_83] : memref<5x1x8xbf16, #tpu.memory_space<vmem>>, vector<1x1x8xbf16>
    %96 = vector.shape_cast %95 : vector<1x1x8xbf16> to vector<1x8xbf16>
    %cst_84 = arith.constant dense<0.000000e+00> : vector<1x100xf32>
    %97 = tpu.matmul %96, %94, %cst_84 {dimension_numbers = #tpu.dot_dimension_numbers<[1], [0], [0], [1], [0, 0, 1, 1], [], []>} : vector<1x8xbf16>, vector<8x100xbf16>, vector<1x100xf32> -> vector<1x100xf32>
    %98 = arith.truncf %97 : vector<1x100xf32> to vector<1x100xbf16>
    %c0_85 = arith.constant 0 : index
    %c0_86 = arith.constant 0 : index
    %c0_87 = arith.constant 0 : index
    %99 = vector.load %arg17[%c0_85, %c0_86, %c0_87] : memref<5x100x128xbf16, #tpu.memory_space<vmem>>, vector<1x100x128xbf16>
    %100 = vector.shape_cast %99 : vector<1x100x128xbf16> to vector<100x128xbf16>
    %cst_88 = arith.constant dense<0.000000e+00> : vector<1x128xf32>
    %101 = tpu.matmul %98, %100, %cst_88 {dimension_numbers = #tpu.dot_dimension_numbers<[1], [0], [0], [1], [0, 0, 1, 1], [], []>} : vector<1x100xbf16>, vector<100x128xbf16>, vector<1x128xf32> -> vector<1x128xf32>
    %c1_89 = arith.constant 1 : index
    %c0_90 = arith.constant 0 : index
    %c0_91 = arith.constant 0 : index
    %102 = vector.load %arg16[%c1_89, %c0_90, %c0_91] : memref<5x1x8xbf16, #tpu.memory_space<vmem>>, vector<1x1x8xbf16>
    %103 = vector.shape_cast %102 : vector<1x1x8xbf16> to vector<1x8xbf16>
    %cst_92 = arith.constant dense<0.000000e+00> : vector<1x100xf32>
    %104 = tpu.matmul %103, %94, %cst_92 {dimension_numbers = #tpu.dot_dimension_numbers<[1], [0], [0], [1], [0, 0, 1, 1], [], []>} : vector<1x8xbf16>, vector<8x100xbf16>, vector<1x100xf32> -> vector<1x100xf32>
    %105 = arith.truncf %104 : vector<1x100xf32> to vector<1x100xbf16>
    %c1_93 = arith.constant 1 : index
    %c0_94 = arith.constant 0 : index
    %c0_95 = arith.constant 0 : index
    %106 = vector.load %arg17[%c1_93, %c0_94, %c0_95] : memref<5x100x128xbf16, #tpu.memory_space<vmem>>, vector<1x100x128xbf16>
    %107 = vector.shape_cast %106 : vector<1x100x128xbf16> to vector<100x128xbf16>
    %cst_96 = arith.constant dense<0.000000e+00> : vector<1x128xf32>
    %108 = tpu.matmul %105, %107, %cst_96 {dimension_numbers = #tpu.dot_dimension_numbers<[1], [0], [0], [1], [0, 0, 1, 1], [], []>} : vector<1x100xbf16>, vector<100x128xbf16>, vector<1x128xf32> -> vector<1x128xf32>
    %109 = arith.addf %101, %108 : vector<1x128xf32>
    %c2_97 = arith.constant 2 : index
    %c0_98 = arith.constant 0 : index
    %c0_99 = arith.constant 0 : index
    %110 = vector.load %arg16[%c2_97, %c0_98, %c0_99] : memref<5x1x8xbf16, #tpu.memory_space<vmem>>, vector<1x1x8xbf16>
    %111 = vector.shape_cast %110 : vector<1x1x8xbf16> to vector<1x8xbf16>
    %cst_100 = arith.constant dense<0.000000e+00> : vector<1x100xf32>
    %112 = tpu.matmul %111, %94, %cst_100 {dimension_numbers = #tpu.dot_dimension_numbers<[1], [0], [0], [1], [0, 0, 1, 1], [], []>} : vector<1x8xbf16>, vector<8x100xbf16>, vector<1x100xf32> -> vector<1x100xf32>
    %113 = arith.truncf %112 : vector<1x100xf32> to vector<1x100xbf16>
    %c2_101 = arith.constant 2 : index
    %c0_102 = arith.constant 0 : index
    %c0_103 = arith.constant 0 : index
    %114 = vector.load %arg17[%c2_101, %c0_102, %c0_103] : memref<5x100x128xbf16, #tpu.memory_space<vmem>>, vector<1x100x128xbf16>
    %115 = vector.shape_cast %114 : vector<1x100x128xbf16> to vector<100x128xbf16>
    %cst_104 = arith.constant dense<0.000000e+00> : vector<1x128xf32>
    %116 = tpu.matmul %113, %115, %cst_104 {dimension_numbers = #tpu.dot_dimension_numbers<[1], [0], [0], [1], [0, 0, 1, 1], [], []>} : vector<1x100xbf16>, vector<100x128xbf16>, vector<1x128xf32> -> vector<1x128xf32>
    %117 = arith.addf %109, %116 : vector<1x128xf32>
    %c3_105 = arith.constant 3 : index
    %c0_106 = arith.constant 0 : index
    %c0_107 = arith.constant 0 : index
    %118 = vector.load %arg16[%c3_105, %c0_106, %c0_107] : memref<5x1x8xbf16, #tpu.memory_space<vmem>>, vector<1x1x8xbf16>
    %119 = vector.shape_cast %118 : vector<1x1x8xbf16> to vector<1x8xbf16>
    %cst_108 = arith.constant dense<0.000000e+00> : vector<1x100xf32>
    %120 = tpu.matmul %119, %94, %cst_108 {dimension_numbers = #tpu.dot_dimension_numbers<[1], [0], [0], [1], [0, 0, 1, 1], [], []>} : vector<1x8xbf16>, vector<8x100xbf16>, vector<1x100xf32> -> vector<1x100xf32>
    %121 = arith.truncf %120 : vector<1x100xf32> to vector<1x100xbf16>
    %c3_109 = arith.constant 3 : index
    %c0_110 = arith.constant 0 : index
    %c0_111 = arith.constant 0 : index
    %122 = vector.load %arg17[%c3_109, %c0_110, %c0_111] : memref<5x100x128xbf16, #tpu.memory_space<vmem>>, vector<1x100x128xbf16>
    %123 = vector.shape_cast %122 : vector<1x100x128xbf16> to vector<100x128xbf16>
    %cst_112 = arith.constant dense<0.000000e+00> : vector<1x128xf32>
    %124 = tpu.matmul %121, %123, %cst_112 {dimension_numbers = #tpu.dot_dimension_numbers<[1], [0], [0], [1], [0, 0, 1, 1], [], []>} : vector<1x100xbf16>, vector<100x128xbf16>, vector<1x128xf32> -> vector<1x128xf32>
    %125 = arith.addf %117, %124 : vector<1x128xf32>
    %c4_113 = arith.constant 4 : index
    %c0_114 = arith.constant 0 : index
    %c0_115 = arith.constant 0 : index
    %126 = vector.load %arg16[%c4_113, %c0_114, %c0_115] : memref<5x1x8xbf16, #tpu.memory_space<vmem>>, vector<1x1x8xbf16>
    %127 = vector.shape_cast %126 : vector<1x1x8xbf16> to vector<1x8xbf16>
    %cst_116 = arith.constant dense<0.000000e+00> : vector<1x100xf32>
    %128 = tpu.matmul %127, %94, %cst_116 {dimension_numbers = #tpu.dot_dimension_numbers<[1], [0], [0], [1], [0, 0, 1, 1], [], []>} : vector<1x8xbf16>, vector<8x100xbf16>, vector<1x100xf32> -> vector<1x100xf32>
    %129 = arith.truncf %128 : vector<1x100xf32> to vector<1x100xbf16>
    %c4_117 = arith.constant 4 : index
    %c0_118 = arith.constant 0 : index
    %c0_119 = arith.constant 0 : index
    %130 = vector.load %arg17[%c4_117, %c0_118, %c0_119] : memref<5x100x128xbf16, #tpu.memory_space<vmem>>, vector<1x100x128xbf16>
    %131 = vector.shape_cast %130 : vector<1x100x128xbf16> to vector<100x128xbf16>
    %cst_120 = arith.constant dense<0.000000e+00> : vector<1x128xf32>
    %132 = tpu.matmul %129, %131, %cst_120 {dimension_numbers = #tpu.dot_dimension_numbers<[1], [0], [0], [1], [0, 0, 1, 1], [], []>} : vector<1x100xbf16>, vector<100x128xbf16>, vector<1x128xf32> -> vector<1x128xf32>
    %133 = arith.addf %125, %132 : vector<1x128xf32>
    %c0_121 = arith.constant 0 : index
    %c0_122 = arith.constant 0 : index
    %134 = vector.load %arg18[%c0_121, %c0_122] : memref<1x128xf32, #tpu.memory_space<vmem>>, vector<1x128xf32>
    %135 = arith.addf %133, %134 : vector<1x128xf32>
    %cst_123 = arith.constant 0.000000e+00 : f32
    %136 = vector.broadcast %cst_123 : f32 to vector<1x128xf32>
    %137 = arith.maximumf %135, %136 : vector<1x128xf32>
    %138 = arith.truncf %137 : vector<1x128xf32> to vector<1x128xbf16>
    %c0_124 = arith.constant 0 : index
    %c0_125 = arith.constant 0 : index
    %139 = vector.load %arg19[%c0_124, %c0_125] : memref<128x128xbf16, #tpu.memory_space<vmem>>, vector<128x128xbf16>
    %cst_126 = arith.constant dense<0.000000e+00> : vector<1x128xf32>
    %140 = tpu.matmul %138, %139, %cst_126 {dimension_numbers = #tpu.dot_dimension_numbers<[1], [0], [0], [1], [0, 0, 1, 1], [], []>} : vector<1x128xbf16>, vector<128x128xbf16>, vector<1x128xf32> -> vector<1x128xf32>
    %c0_127 = arith.constant 0 : index
    %c0_128 = arith.constant 0 : index
    %141 = vector.load %arg20[%c0_127, %c0_128] : memref<1x128xf32, #tpu.memory_space<vmem>>, vector<1x128xf32>
    %142 = arith.addf %140, %141 : vector<1x128xf32>
    %c0_129 = arith.constant 0 : index
    %c0_130 = arith.constant 0 : index
    %c0_131 = arith.constant 0 : index
    %143 = vector.load %arg21[%c0_129, %c0_130, %c0_131] : memref<1x1x128xf32, #tpu.memory_space<vmem>>, vector<1x1x128xf32>
    %144 = vector.shape_cast %143 : vector<1x1x128xf32> to vector<1x128xf32>
    %145 = vector.shape_cast %142 : vector<1x128xf32> to vector<1x1x128xf32>
    tpu.vector_store %arg21[%c0_129, %c0_130, %c0_131], %145 {strides = array<i32>} : memref<1x1x128xf32, #tpu.memory_space<vmem>>, vector<1x1x128xf32>,
    return
  }
  func.func @transform_0(%arg0: i32) -> (i32, i32) {
    %c0_i32 = arith.constant 0 : i32
    %c0_i32_0 = arith.constant 0 : i32
    return %arg0, %c0_i32 : i32, i32
  }
  func.func @transform_1(%arg0: i32) -> (i32, i32) {
    %c0_i32 = arith.constant 0 : i32
    %c0_i32_0 = arith.constant 0 : i32
    return %arg0, %c0_i32 : i32, i32
  }
  func.func @transform_2(%arg0: i32) -> (i32, i32) {
    %c0_i32 = arith.constant 0 : i32
    %c0_i32_0 = arith.constant 0 : i32
    return %arg0, %c0_i32 : i32, i32
  }
  func.func @transform_3(%arg0: i32) -> (i32, i32) {
    %c0_i32 = arith.constant 0 : i32
    %c0_i32_0 = arith.constant 0 : i32
    return %arg0, %c0_i32 : i32, i32
  }
  func.func @transform_4(%arg0: i32) -> (i32, i32) {
    %c0_i32 = arith.constant 0 : i32
    %c0_i32_0 = arith.constant 0 : i32
    %c0_i32_1 = arith.constant 0 : i32
    return %c0_i32, %c0_i32_0 : i32, i32
  }
  func.func @transform_5(%arg0: i32) -> (i32, i32) {
    %c0_i32 = arith.constant 0 : i32
    %c0_i32_0 = arith.constant 0 : i32
    %c0_i32_1 = arith.constant 0 : i32
    return %c0_i32, %c0_i32_0 : i32, i32
  }
  func.func @transform_6(%arg0: i32) -> (i32, i32) {
    %c0_i32 = arith.constant 0 : i32
    %c0_i32_0 = arith.constant 0 : i32
    %c0_i32_1 = arith.constant 0 : i32
    return %c0_i32, %c0_i32_0 : i32, i32
  }
  func.func @transform_7(%arg0: i32) -> (i32, i32) {
    %c0_i32 = arith.constant 0 : i32
    %c0_i32_0 = arith.constant 0 : i32
    %c0_i32_1 = arith.constant 0 : i32
    return %c0_i32, %c0_i32_0 : i32, i32
  }
  func.func @transform_8(%arg0: i32) -> (i32, i32, i32) {
    %c0_i32 = arith.constant 0 : i32
    %c0_i32_0 = arith.constant 0 : i32
    %c0_i32_1 = arith.constant 0 : i32
    %c0_i32_2 = arith.constant 0 : i32
    return %c0_i32, %c0_i32_0, %c0_i32_1 : i32, i32, i32
  }
  func.func @transform_9(%arg0: i32) -> (i32, i32) {
    %c0_i32 = arith.constant 0 : i32
    %c0_i32_0 = arith.constant 0 : i32
    %c0_i32_1 = arith.constant 0 : i32
    return %c0_i32, %c0_i32_0 : i32, i32
  }
  func.func @transform_10(%arg0: i32) -> (i32, i32) {
    %c0_i32 = arith.constant 0 : i32
    %c0_i32_0 = arith.constant 0 : i32
    %c0_i32_1 = arith.constant 0 : i32
    return %c0_i32, %c0_i32_0 : i32, i32
  }
  func.func @transform_11(%arg0: i32) -> (i32, i32) {
    %c0_i32 = arith.constant 0 : i32
    %c0_i32_0 = arith.constant 0 : i32
    %c0_i32_1 = arith.constant 0 : i32
    return %c0_i32, %c0_i32_0 : i32, i32
  }
  func.func @transform_12(%arg0: i32) -> (i32, i32) {
    %c0_i32 = arith.constant 0 : i32
    %c0_i32_0 = arith.constant 0 : i32
    %c0_i32_1 = arith.constant 0 : i32
    return %c0_i32, %c0_i32_0 : i32, i32
  }
  func.func @transform_13(%arg0: i32) -> (i32, i32) {
    %c0_i32 = arith.constant 0 : i32
    %c0_i32_0 = arith.constant 0 : i32
    %c0_i32_1 = arith.constant 0 : i32
    return %c0_i32, %c0_i32_0 : i32, i32
  }
  func.func @transform_14(%arg0: i32) -> (i32, i32) {
    %c0_i32 = arith.constant 0 : i32
    %c0_i32_0 = arith.constant 0 : i32
    %c0_i32_1 = arith.constant 0 : i32
    return %c0_i32, %c0_i32_0 : i32, i32
  }
  func.func @transform_15(%arg0: i32) -> (i32, i32, i32) {
    %c0_i32 = arith.constant 0 : i32
    %c0_i32_0 = arith.constant 0 : i32
    %c0_i32_1 = arith.constant 0 : i32
    %c0_i32_2 = arith.constant 0 : i32
    return %c0_i32, %c0_i32_0, %c0_i32_1 : i32, i32, i32
  }
  func.func @transform_16(%arg0: i32) -> (i32, i32, i32) {
    %c0_i32 = arith.constant 0 : i32
    %c0_i32_0 = arith.constant 0 : i32
    %c0_i32_1 = arith.constant 0 : i32
    %c0_i32_2 = arith.constant 0 : i32
    return %c0_i32, %c0_i32_0, %c0_i32_1 : i32, i32, i32
  }
  func.func @transform_17(%arg0: i32) -> (i32, i32) {
    %c0_i32 = arith.constant 0 : i32
    %c0_i32_0 = arith.constant 0 : i32
    %c0_i32_1 = arith.constant 0 : i32
    return %c0_i32, %c0_i32_0 : i32, i32
  }
  func.func @transform_18(%arg0: i32) -> (i32, i32) {
    %c0_i32 = arith.constant 0 : i32
    %c0_i32_0 = arith.constant 0 : i32
    %c0_i32_1 = arith.constant 0 : i32
    return %c0_i32, %c0_i32_0 : i32, i32
  }
  func.func @transform_19(%arg0: i32) -> (i32, i32) {
    %c0_i32 = arith.constant 0 : i32
    %c0_i32_0 = arith.constant 0 : i32
    %c0_i32_1 = arith.constant 0 : i32
    return %c0_i32, %c0_i32_0 : i32, i32
  }
  func.func @transform_20(%arg0: i32) -> (i32, i32, i32) {
    %c0_i32 = arith.constant 0 : i32
    %c0_i32_0 = arith.constant 0 : i32
    %c0_i32_1 = arith.constant 0 : i32
    return %arg0, %c0_i32, %c0_i32_0 : i32, i32, i32
  }
}

</mosaic_0001>

<bundles_post_ra>
// kernel: cnn_forward_pallas.1
= control target key start
LH: loop header
LB: loop body
LE: loop exit
PB: predicated region body
PF: predicated region fallthrough
CT: control target
= control target key end

     0   :  { %s7587_s0 = inlined_call_operand.vmem [shape: bf16[16,150], index: 0, kind: input, shape index: {}]   ;;  %s7588_s1 = inlined_call_operand.vmem [shape: bf16[16,150], index: 1, kind: input, shape index: {}]   ;;  %s7589_s2 = inlined_call_operand.vmem [shape: bf16[16,150], index: 2, kind: input, shape index: {}]   ;;  %s7590_s3 = inlined_call_operand.vmem [shape: bf16[16,150], index: 3, kind: input, shape index: {}]   ;;  %s7591_s4 = inlined_call_operand.vmem [shape: bf16[150,260], index: 4, kind: input, shape index: {}]   ;;  %s7592_s5 = inlined_call_operand.vmem [shape: bf16[260,130], index: 5, kind: input, shape index: {}]   ;;  %s7593_s6 = inlined_call_operand.vmem [shape: bf16[260,130], index: 6, kind: input, shape index: {}]   ;;  %s7594_s7 = inlined_call_operand.vmem [shape: f32[1,130], index: 7, kind: input, shape index: {}]   ;;  %s7595_s8 = inlined_call_operand.vmem [shape: bf16[5,130,220], index: 8, kind: input, shape index: {}]   ;;  %s7596_s9 = inlined_call_operand.vmem [shape: bf16[8,8], index: 9, kind: input, shape index: {}]   ;;  %s7597_s10 = inlined_call_operand.vmem [shape: bf16[8,8], index: 10, kind: input, shape index: {}]   ;;  %s7598_s11 = inlined_call_operand.vmem [shape: bf16[8,8], index: 11, kind: input, shape index: {}]   ;;  %s7599_s12 = inlined_call_operand.vmem [shape: bf16[220,100], index: 12, kind: input, shape index: {}]   ;;  %s7600_s13 = inlined_call_operand.vmem [shape: bf16[220,100], index: 13, kind: input, shape index: {}]   ;;  %s7601_s14 = inlined_call_operand.vmem [shape: f32[1,100], index: 14, kind: input, shape index: {}]   ;;  %s7602_s15 = inlined_call_operand.vmem [shape: bf16[5,1,8], index: 15, kind: input, shape index: {}]   ;;  %s7603_s16 = inlined_call_operand.vmem [shape: bf16[5,100,128], index: 16, kind: input, shape index: {}]   ;;  %s7604_s17 = inlined_call_operand.vmem [shape: f32[1,128], index: 17, kind: input, shape index: {}]   ;;  %s7605_s18 = inlined_call_operand.vmem [shape: bf16[128,128], index: 18, kind: input, shape index: {}]   ;;  %s7606_s19 = inlined_call_operand.vmem [shape: f32[1,128], index: 19, kind: input, shape index: {}]   ;;  %s7607_s20 = inlined_call_operand.hbm [shape: f32[2,1,128], index: 20, kind: output, shape index: {}]  }
   0x1   :  { %7615 = sst [smem:[#allocation11_spill]] %s7587_s0 }
   0x2   :  { %7616 = sst [smem:[#allocation12_spill]] %s7588_s1 }
   0x3   :  { %7617 = sst [smem:[#allocation13_spill]] %s7589_s2 }
   0x4   :  { %7618 = sst [smem:[#allocation14_spill]] %s7590_s3 }
   0x5   :  { %7619 = sst [smem:[#allocation15_spill]] %s7591_s4 }
   0x6   :  { %25 = vsyncpa [#allocation3], 0 }
   0x7   :  { %27 = vsyncpa [#allocation3 + $0x1], 0  ;;  %s5770_s1 = smov 0   ;;  %s5772_s22 = smov 0  }
   0x8   :  { %s5774_s23 = smov 0   ;;  %s5776_s24 = smov 0  }
   0x9 LB: > { %7620 = sst [smem:[#allocation5_spill]] %s5647_s1  ;;  %s5791_s2 = sadd.s32 4294967295, %s5659_s24   ;;  %s5659_s24 = sphi %s5776_s24, %s7636_s24   ;;  %s5655_s23 = sphi %s5774_s23, %s7638_s23   ;;  %s5651_s22 = sphi %s5772_s22, %s7640_s22   ;;  %s5647_s1 = sphi %s5770_s1, %s7639_s1  }
   0xa   : > { %7621 = sst [smem:[#allocation6_spill]] %s5655_s23  ;;  %s4491_s25 = sadd.s32 4294967294, %s5659_s24  }
   0xb   : > { %7622 = sst [smem:[#allocation7_spill]] %s5659_s24  ;;  %s5795_s3 = sadd.s32 1, %s5659_s24  }
   0xc   : > { %7623 = sst [smem:[#allocation8_spill]] %s5795_s3  ;;  %s480_s26 = sadd.s32 1, %s5655_s23 }
   0xd   : > { %s477_s27 = ssub.s32 %s5659_s24, %s5795_s3  ;;  %p490_p0 = scmp.ne.s32.totalorder %s5655_s23, %s5651_s22 }
   0xe   : > { %p478_p1 = scmp.eq.s32.totalorder %s477_s27, 0  ;;  %p491_p2 = scmp.eq.s32.totalorder %s5791_s2, 1 }
   0xf   : > { %p496_p3 = scmp.ne.s32.totalorder %s5651_s22, %s5647_s1  ;;  %p497_p4 = scmp.eq.s32.totalorder %s4491_s25, 1 }
  0x10   : > { %s5806_s28 = scalar_select %p478_p1, %s5655_s23, %s480_s26  }
  0x11   : > { %p5808_p5 = por %p491_p2, %p490_p0  ;;  %p5812_p6 = por %p497_p4, %p496_p3 }
  0x12   : > { %7624 = sst [smem:[#allocation9_spill]] %s5806_s28  ;;  %p4494_p7 = scmp.ge.s32.totalorder %s5659_s24, 1 }
  0x13   : > { %s7626_s29 = scalar_select %p5812_p6, 1, 0 }
  0x14   : > { %p595_p8 = scmp.lt.s32.totalorder %s5659_s24, 3 }
  0x15   : > { %7627 = sst [smem:[#allocation10_spill]] %s7626_s29 }
  0x16   : > { %p596_p9 = pnand %p4494_p7, %p595_p8 }
  0x17   : > { %s7628_s21 = sld [smem:[#allocation15_spill]] (!%p596_p9)  ;;  %v5661_v1 = vmov (!%p596_p9), 0   ;;  %p667_p10 = scmp.lt.s32.totalorder (!%p596_p9), %s5791_s2, 1  ;;  %vm885_vm0 = vcmask (!%p596_p9), 179200   ;;  %vm889_vm1 = vcmask (!%p596_p9), 1042432   ;;  %vm1501_vm2 = vcmask (!%p596_p9), 1041408  }
  0x18   : > { %599 = sbr.rel (%p596_p9) target bundleno = 2574 (0xa0e), region = 100  ;;  %940 = vmatprep.subr.bf16.mxu1 (!%p596_p9), %v5661_v1  ;;  %s7629_s3 = sld [smem:[#allocation11_spill]] (!%p596_p9)  ;;  %v6160_v45 = vld [vmem:[%s7592_s5 + $0x4] ss:$8 sps:$4 sm:$0xff] (!%p596_p9)   ;;  %v6167_v47 = vld [vmem:[%s7592_s5] ss:$8 sps:$4 sm:$0xff] (!%p596_p9)  }
  0x19   : > { %s7630_s28 = sld [smem:[#allocation12_spill]] (!%p596_p9)  ;;  %s7632_s1 = sld [smem:[#allocation14_spill]] (!%p596_p9)  ;;  %v6173_v48 = vld [vmem:[%s7592_s5 + $0x14] ss:$8 sps:$4 sm:$0xff] (!%p596_p9)   ;;  %v1285_v49 = vld [vmem:[%s7592_s5 + $0x100] sm:$0x33] (!%p596_p9) }
  0x1a   : > { %v6178_v50 = vcombine.high (!%p596_p9), %v1285_v49, %v1285_v49  ;;  %v4585_v51 = vcombine.low (!%p596_p9), %v1285_v49, %v1285_v49  ;;  %v6185_v52 = vld [vmem:[%s7592_s5 + $0x10] ss:$8 sps:$4 sm:$0xff] (!%p596_p9)   ;;  %v6191_v53 = vld [vmem:[%s7592_s5 + $0x24] ss:$8 sps:$4 sm:$0xff] (!%p596_p9)   ;;  %v6208_v56 = vld [vmem:[%s7592_s5 + $0x20] ss:$8 sps:$4 sm:$0xff] (!%p596_p9)  }
  0x1b   : > { %v6202_v55 = vld [vmem:[%s7593_s6 + $0x4] ss:$8 sps:$4 sm:$0xff] (!%p596_p9)   ;;  %v6214_v57 = vld [vmem:[%s7592_s5 + $0x34] ss:$8 sps:$4 sm:$0xff] (!%p596_p9)   ;;  %v6221_v58 = vld [vmem:[%s7592_s5 + $0x30] ss:$8 sps:$4 sm:$0xff] (!%p596_p9)  }
  0x1c   : > { %v6196_v54 = vsel (!%p596_p9), %vm1501_vm2, %v4585_v51, 0  ;;  %v6227_v59 = vld [vmem:[%s7592_s5 + $0x44] ss:$8 sps:$4 sm:$0xff] (!%p596_p9)   ;;  %v6233_v60 = vld [vmem:[%s7592_s5 + $0x40] ss:$8 sps:$4 sm:$0xff] (!%p596_p9)   ;;  %vm1497_vm3 = vcmask (!%p596_p9), 31744  }
  0x1d   : > { %v5821_v0 = vld [vmem:[%s7628_s21 + $0x4] ss:$12 sps:$4 sm:$0xff] (!%p596_p9)   ;;  %v5827_v2 = vld [vmem:[%s7628_s21 + $0x8] ss:$12 sps:$4 sm:$0xff] (!%p596_p9)   ;;  %v5833_v3 = vld [vmem:[%s7628_s21] ss:$12 sps:$4 sm:$0xff] (!%p596_p9)  }
  0x1e   : > { %899 = vmatprep.subr.bf16.mxu0 (!%p596_p9), %v5821_v0  ;;  %941 = vmatpush1.bf16.msra.mxu1 (!%p596_p9), %v5827_v2  ;;  %v5839_v4 = vld [vmem:[%s7628_s21 + $0x1c] ss:$12 sps:$4 sm:$0xff] (!%p596_p9)   ;;  %v5846_v5 = vld [vmem:[%s7628_s21 + $0x20] ss:$12 sps:$4 sm:$0xff] (!%p596_p9)   ;;  %v5851_v6 = vld [vmem:[%s7628_s21 + $0x18] ss:$12 sps:$4 sm:$0xff] (!%p596_p9)  }
  0x1f   : > { %900 = vmatpush1.bf16.msra.mxu0 %v5833_v3  ;;  %942 = vmatprep.subr.bf16.mxu1 %v5661_v1  ;;  %v5857_v7 = vld [vmem:[%s7628_s21 + $0x34] ss:$12 sps:$4 sm:$0xff]   ;;  %v5864_v8 = vld [vmem:[%s7628_s21 + $0x38] ss:$12 sps:$4 sm:$0xff]   ;;  %v5871_v9 = vld [vmem:[%s7628_s21 + $0x30] ss:$12 sps:$4 sm:$0xff]  }
  0x20   : > { %901 = vmatprep.subr.bf16.mxu0 %v5839_v4  ;;  %v5877_v10 = vld [vmem:[%s7628_s21 + $0x4c] ss:$12 sps:$4 sm:$0xff]   ;;  %s668_s30 = scalar_select %p667_p10, %s5791_s2, 1  ;;  %v5884_v11 = vld [vmem:[%s7628_s21 + $0x50] ss:$12 sps:$4 sm:$0xff]   ;;  %vm2042_vm4 = vcmask 1043456  }
  0x21   : > { %v5891_v12 = vld [vmem:[%s7628_s21 + $0x48] ss:$12 sps:$4 sm:$0xff]   ;;  %v5897_v13 = vld [vmem:[%s7628_s21 + $0x64] ss:$12 sps:$4 sm:$0xff]   ;;  %v5912_v15 = vld [vmem:[%s7628_s21 + $0x60] ss:$12 sps:$4 sm:$0xff]  }
  0x22   : > { %943 = vmatpush1.bf16.msra.mxu1 %v5846_v5  ;;  %s5899_s27 = sshll.u32 %s668_s30, 3  ;;  %v5905_v14 = vld [vmem:[%s7628_s21 + $0x68] ss:$12 sps:$4 sm:$0xff]   ;;  %v5928_v17 = vld [vmem:[%s7628_s21 + $0x80] ss:$12 sps:$4 sm:$0xff]   ;;  %vm2038_vm5 = vcmask 64512  }
  0x23   : > { %902 = vmatpush1.bf16.msra.mxu0 %v5851_v6  ;;  %944 = vmatprep.subr.bf16.mxu1 %v5661_v1  ;;  %v5918_v16 = vld [vmem:[%s7628_s21 + $0x7c] ss:$12 sps:$4 sm:$0xff]   ;;  %s671_s29 = scalar_lea.vmem %s7629_s3, %s5899_s27  ;;  %v5935_v18 = vld [vmem:[%s7628_s21 + $0x78] ss:$12 sps:$4 sm:$0xff]   ;;  %v5941_v19 = vld [vmem:[%s7628_s21 + $0x94] ss:$12 sps:$4 sm:$0xff]   ;;  %s676_s23 = scalar_lea.vmem %s7630_s28, %s5899_s27 }
  0x24   : > { %903 = vmatprep.subr.bf16.mxu0 %v5857_v7  ;;  %v726_v20 = vld [vmem:[%s671_s29] sm:$0xff]  ;;  %v5951_v22 = vld [vmem:[%s7628_s21 + $0x90] ss:$12 sps:$4 sm:$0xff]   ;;  %v5957_v24 = vld [vmem:[%s7628_s21 + $0xac] ss:$12 sps:$4 sm:$0xff]   ;;  %s7631_s29 = sld [smem:[#allocation13_spill]]  ;;  %s686_s24 = scalar_lea.vmem %s7632_s1, %s5899_s27 }
  0x25   : > { %v5946_v21 = vld [vmem:[%s7628_s21 + $0x98] ss:$12 sps:$4 sm:$0xff]   ;;  %v4504_v23 = vcombine.high %v726_v20, %v726_v20  ;;  %v5965_v25 = vld [vmem:[%s7628_s21 + $0xb0] ss:$12 sps:$4 sm:$0xff]   ;;  %v5971_v26 = vld [vmem:[%s7628_s21 + $0xa8] ss:$12 sps:$4 sm:$0xff]   ;;  %v4503_v37 = vcombine.low %v726_v20, %v726_v20 }
  0x26   : > { %945 = vmatpush1.bf16.msra.mxu1 %v5864_v8  ;;  %v5978_v27 = vld [vmem:[%s7628_s21 + $0xc4] ss:$12 sps:$4 sm:$0xff]   ;;  %v724_v28 = vld [vmem:[%s7628_s21 + $0xd8] sm:$0x77]  ;;  %v5989_v29 = vld [vmem:[%s7628_s21 + $0xc8] ss:$12 sps:$4 sm:$0xff]  }
  0x27   : > { %904 = vmatpush1.bf16.msra.mxu0 %v5871_v9  ;;  %946 = vmatprep.subr.bf16.mxu1 %v5661_v1  ;;  %v5994_v30 = vld [vmem:[%s7628_s21 + $0xc0] ss:$12 sps:$4 sm:$0xff]   ;;  %v6003_v32 = vcombine.high %v724_v28, %v724_v28  ;;  %v4532_v33 = vcombine.low %v724_v28, %v724_v28  ;;  %v6239_v61 = vld [vmem:[%s7592_s5 + $0x54] ss:$8 sps:$4 sm:$0xff]   ;;  %v6245_v62 = vld [vmem:[%s7592_s5 + $0x50] ss:$8 sps:$4 sm:$0xff]  }
  0x28   : > { %905 = vmatprep.subr.bf16.mxu0 %v5877_v10  ;;  %4537 = vmatprep.mubr.msk.bf16.mxu1 %vm885_vm0, %v4504_v23  ;;  %v5286_v31 = vld [vmem:[%s7628_s21 + $0xe0] ss:$0 sps:$4 sm:$0x77]   ;;  %v6251_v63 = vld [vmem:[%s7592_s5 + $0x64] ss:$8 sps:$4 sm:$0xff]   ;;  %vm2355_vm6 = vcmask 15360  }
  0x29   : > { %4536 = vmatprep.mubr.msk.bf16.mxu0 %vm885_vm0, %v4504_v23  ;;  %v6013_v34 = vsel %vm889_vm1, %v5286_v31, 0  ;;  %v980_v35 = vld [vmem:[%s676_s23] sm:$0xff]  ;;  %v6018_v36 = vsel %vm889_vm1, %v4532_v33, 0  ;;  %v6411_v49 = vld [vmem:[%s7593_s6 + $0x34] ss:$8 sps:$4 sm:$0xff]   ;;  %vm2358_vm7 = vcmask 1040384  }
  0x2a   : > { %947 = vmatpush1.bf16.msra.mxu1 %v5884_v11  ;;  %v4539_v38 = vcombine.high %v980_v35, %v980_v35  ;;  %s681_s25 = scalar_lea.vmem %s7631_s29, %s5899_s27  ;;  %v4538_v40 = vcombine.low %v980_v35, %v980_v35  ;;  %v1162_v42 = vld [vmem:[%s686_s24] sm:$0xff]  ;;  %vm3338_vm8 = vcmask 1045504   ;;  %vm3334_vm9 = vcmask 752640   ;;  %s665_s0 = sand.u32 1, %s5651_s22  }
  0x2b   : > { %906 = vmatpush1.bf16.msra.mxu0 %v5891_v12  ;;  %948 = vmatprep.subr.bf16.mxu1 %v5661_v1  ;;  %v1071_v39 = vld [vmem:[%s681_s25] sm:$0xff]  ;;  %v4549_v44 = vcombine.high %v1162_v42, %v1162_v42  ;;  %v4548_v46 = vcombine.low %v1162_v42, %v1162_v42  ;;  %vm5663_vm10 = vmmov 0   ;;  %vm3707_vm11 = vcmask 818176   ;;  %s4955_s30 = sshll.u32 %s5791_s2, 4  ;;  %s666_s26 = scalar_lea.vmem [#allocation2], %s665_s0 }
  0x2c   : > { %907 = vmatprep.subr.bf16.mxu0 %v5897_v13  ;;  %v4544_v41 = vcombine.high %v1071_v39, %v1071_v39  ;;  %v4543_v43 = vcombine.low %v1071_v39, %v1071_v39  ;;  %v6373_v35 = vld [vmem:[%s7593_s6] ss:$8 sps:$4 sm:$0xff]   ;;  %v6380_v39 = vld [vmem:[%s7593_s6 + $0x14] ss:$8 sps:$4 sm:$0xff]   ;;  %s4400_s1 = sshll.u32 %s666_s26, 4  ;;  %s7545_s28 = scalar_lea.hbm %s7607_s20, %s4955_s30  ;;  %s7547_s1 = int_to_ptr.vmem [resolvable:$true] %s4400_s1 }
  0x2d   : > { %v6432_v51 = vld [vmem:[%s7593_s6 + $0x40] ss:$8 sps:$4 sm:$0xff]   ;;  %s4388_s23 = scalar_lea.sflag [#allocation3], %s665_s0  ;;  %s5597_s2 = scalar_lea.vmem %s7547_s1, 16 }
  0x2e   : > { %949 = vmatpush1.bf16.msra.mxu1 %v5905_v14  ;;  %p5598_p11 = scmp.ne.s32.totalorder %s7547_s1, %s5597_s2  ;;  %s5664_s3 = smov [#allocation2]  }
  0x2f   : > { %908 = vmatpush1.bf16.msra.mxu0 %v5912_v15  ;;  %950 = vmatprep.subr.bf16.mxu1 %v5661_v1  ;;  %s5601_s29 = sshll.u32 %s5664_s3, 4  ;;  %s5602_s29 = int_to_ptr.vmem [resolvable:$false] %s5601_s29 }
  0x30   : > { %909 = vmatprep.subr.bf16.mxu0 %v5918_v16  ;;  %p5599_p12 = pnand %p5598_p11, %p5808_p5  ;;  %s5603_s25 = scalar_lea.vmem %s5602_s29, 32 }
  0x31   : > { %p5604_p0 = scmp.lt.s32.totalorder %s7547_s1, %s5602_s29  ;;  %p5605_p1 = scmp.lt.s32.totalorder %s5603_s25, %s5597_s2 }
  0x32   : > { %951 = vmatpush1.bf16.msra.mxu1 %v5928_v17  ;;  %p5600_p13 = pneg %p5599_p12 }
  0x33   : > { %910 = vmatpush1.bf16.msra.mxu0 %v5935_v18  ;;  %952 = vmatprep.subr.bf16.mxu1 %v5661_v1  ;;  %p5606_p2 = por %p5605_p1, %p5604_p0 }
  0x34   : > { %911 = vmatprep.subr.bf16.mxu0 %v5941_v19 }
  0x35   : > { %p5607_p3 = pnand %p5606_p2, %p5600_p13 }
  0x36   : > { %953 = vmatpush1.bf16.msra.mxu1 %v5946_v21 }
  0x37   : > { %912 = vmatpush1.bf16.msra.mxu0 %v5951_v22  ;;  %954 = vmatprep.subr.bf16.mxu1 %v5661_v1 }
  0x38   : > { %913 = vmatprep.subr.bf16.mxu0 %v5957_v24 }
  0x3a   : > { %955 = vmatpush1.bf16.msra.mxu1 %v5965_v25 }
  0x3b   : > { %914 = vmatpush1.bf16.msra.mxu0 %v5971_v26  ;;  %956 = vmatprep.subr.bf16.mxu1 %v5661_v1 }
  0x3c   : > { %915 = vmatprep.subr.bf16.mxu0 %v5978_v27 }
  0x3e   : > { %957 = vmatpush1.bf16.msra.mxu1 %v5989_v29 }
  0x3f   : > { %916 = vmatpush1.bf16.msra.mxu0 %v5994_v30  ;;  %958 = vmatprep.subr.bf16.mxu1 %v5661_v1 }
  0x40   : > { %4535 = vmatprep.subr.msk.bf16.mxu0 %vm889_vm1, %v6003_v32 }
  0x42   : > { %959 = vmatpush1.bf16.msra.mxu1 %v6013_v34 }
  0x43   : > { %918 = vmatpush1.bf16.msra.mxu0 %v6018_v36  ;;  %1031 = vmatprep.subr.bf16.mxu1 %v5661_v1 }
  0x44   : > { %990 = vmatprep.subr.bf16.mxu0 %v5821_v0 }
  0x45   : > { %973 = vmatmul.mubr.bf16.vlgmr.msra.gmra.mrb[0].mxu1 %v4503_v37 }
  0x46   : > { %1032 = vmatpush1.bf16.msra.mxu1 %v5827_v2  ;;  %932 = vmatmul.mubr.bf16.vlgmr.msra.gmra.mrb[0].mxu0 %v4503_v37 }
  0x47   : > { %991 = vmatpush1.bf16.msra.mxu0 %v5833_v3  ;;  %1033 = vmatprep.subr.bf16.mxu1 %v5661_v1 }
  0x48   : > { %992 = vmatprep.subr.bf16.mxu0 %v5839_v4  ;;  %4542 = vmatprep.mubr.msk.bf16.mxu1 %vm885_vm0, %v4539_v38 }
  0x49   : > { %4541 = vmatprep.mubr.msk.bf16.mxu0 %vm885_vm0, %v4539_v38 }
  0x4a   : > { %1034 = vmatpush1.bf16.msra.mxu1 %v5846_v5 }
  0x4b   : > { %993 = vmatpush1.bf16.msra.mxu0 %v5851_v6  ;;  %1035 = vmatprep.subr.bf16.mxu1 %v5661_v1 }
  0x4c   : > { %994 = vmatprep.subr.bf16.mxu0 %v5857_v7 }
  0x4e   : > { %1036 = vmatpush1.bf16.msra.mxu1 %v5864_v8 }
  0x4f   : > { %995 = vmatpush1.bf16.msra.mxu0 %v5871_v9  ;;  %1037 = vmatprep.subr.bf16.mxu1 %v5661_v1 }
  0x50   : > { %996 = vmatprep.subr.bf16.mxu0 %v5877_v10 }
  0x52   : > { %1038 = vmatpush1.bf16.msra.mxu1 %v5884_v11 }
  0x53   : > { %997 = vmatpush1.bf16.msra.mxu0 %v5891_v12  ;;  %1039 = vmatprep.subr.bf16.mxu1 %v5661_v1 }
  0x54   : > { %998 = vmatprep.subr.bf16.mxu0 %v5897_v13 }
  0x56   : > { %1040 = vmatpush1.bf16.msra.mxu1 %v5905_v14 }
  0x57   : > { %999 = vmatpush1.bf16.msra.mxu0 %v5912_v15  ;;  %1041 = vmatprep.subr.bf16.mxu1 %v5661_v1 }
  0x58   : > { %1000 = vmatprep.subr.bf16.mxu0 %v5918_v16 }
  0x5a   : > { %1042 = vmatpush1.bf16.msra.mxu1 %v5928_v17 }
  0x5b   : > { %1001 = vmatpush1.bf16.msra.mxu0 %v5935_v18  ;;  %1043 = vmatprep.subr.bf16.mxu1 %v5661_v1 }
  0x5c   : > { %1002 = vmatprep.subr.bf16.mxu0 %v5941_v19 }
  0x5e   : > { %1044 = vmatpush1.bf16.msra.mxu1 %v5946_v21 }
  0x5f   : > { %1003 = vmatpush1.bf16.msra.mxu0 %v5951_v22  ;;  %1045 = vmatprep.subr.bf16.mxu1 %v5661_v1 }
  0x60   : > { %1004 = vmatprep.subr.bf16.mxu0 %v5957_v24 }
  0x62   : > { %1046 = vmatpush1.bf16.msra.mxu1 %v5965_v25 }
  0x63   : > { %1005 = vmatpush1.bf16.msra.mxu0 %v5971_v26  ;;  %1047 = vmatprep.subr.bf16.mxu1 %v5661_v1 }
  0x64   : > { %1006 = vmatprep.subr.bf16.mxu0 %v5978_v27 }
  0x66   : > { %1048 = vmatpush1.bf16.msra.mxu1 %v5989_v29 }
  0x67   : > { %1007 = vmatpush1.bf16.msra.mxu0 %v5994_v30  ;;  %1049 = vmatprep.subr.bf16.mxu1 %v5661_v1 }
  0x68   : > { %4540 = vmatprep.subr.msk.bf16.mxu0 %vm889_vm1, %v6003_v32 }
  0x6a   : > { %1050 = vmatpush1.bf16.msra.mxu1 %v6013_v34 }
  0x6b   : > { %1009 = vmatpush1.bf16.msra.mxu0 %v6018_v36  ;;  %1122 = vmatprep.subr.bf16.mxu1 %v5661_v1 }
  0x6c   : > { %1081 = vmatprep.subr.bf16.mxu0 %v5821_v0 }
  0x6d   : > { %1064 = vmatmul.mubr.bf16.vlgmr.msra.gmra.mrb[4].mxu1 %v4538_v40 }
  0x6e   : > { %1023 = vmatmul.mubr.bf16.vlgmr.msra.gmra.mrb[4].mxu0 %v4538_v40  ;;  %1123 = vmatpush1.bf16.msra.mxu1 %v5827_v2 }
  0x6f   : > { %1082 = vmatpush1.bf16.msra.mxu0 %v5833_v3  ;;  %1124 = vmatprep.subr.bf16.mxu1 %v5661_v1 }
  0x70   : > { %1083 = vmatprep.subr.bf16.mxu0 %v5839_v4  ;;  %4546 = vmatprep.mubr.msk.bf16.mxu0 %vm885_vm0, %v4544_v41 }
  0x71   : > { %4547 = vmatprep.mubr.msk.bf16.mxu1 %vm885_vm0, %v4544_v41 }
  0x72   : > { %1125 = vmatpush1.bf16.msra.mxu1 %v5846_v5 }
  0x73   : > { %1084 = vmatpush1.bf16.msra.mxu0 %v5851_v6  ;;  %1126 = vmatprep.subr.bf16.mxu1 %v5661_v1 }
  0x74   : > { %1085 = vmatprep.subr.bf16.mxu0 %v5857_v7 }
  0x76   : > { %1127 = vmatpush1.bf16.msra.mxu1 %v5864_v8 }
  0x77   : > { %1086 = vmatpush1.bf16.msra.mxu0 %v5871_v9  ;;  %1128 = vmatprep.subr.bf16.mxu1 %v5661_v1 }
  0x78   : > { %1087 = vmatprep.subr.bf16.mxu0 %v5877_v10 }
  0x7a   : > { %1129 = vmatpush1.bf16.msra.mxu1 %v5884_v11 }
  0x7b   : > { %1088 = vmatpush1.bf16.msra.mxu0 %v5891_v12  ;;  %1130 = vmatprep.subr.bf16.mxu1 %v5661_v1 }
  0x7c   : > { %1089 = vmatprep.subr.bf16.mxu0 %v5897_v13 }
  0x7e   : > { %1131 = vmatpush1.bf16.msra.mxu1 %v5905_v14 }
  0x7f   : > { %1090 = vmatpush1.bf16.msra.mxu0 %v5912_v15  ;;  %1132 = vmatprep.subr.bf16.mxu1 %v5661_v1 }
  0x80   : > { %1091 = vmatprep.subr.bf16.mxu0 %v5918_v16 }
  0x82   : > { %1133 = vmatpush1.bf16.msra.mxu1 %v5928_v17 }
  0x83   : > { %1092 = vmatpush1.bf16.msra.mxu0 %v5935_v18  ;;  %1134 = vmatprep.subr.bf16.mxu1 %v5661_v1 }
  0x84   : > { %1093 = vmatprep.subr.bf16.mxu0 %v5941_v19 }
  0x86   : > { %1135 = vmatpush1.bf16.msra.mxu1 %v5946_v21 }
  0x87   : > { %1094 = vmatpush1.bf16.msra.mxu0 %v5951_v22  ;;  %1136 = vmatprep.subr.bf16.mxu1 %v5661_v1 }
  0x88   : > { %1095 = vmatprep.subr.bf16.mxu0 %v5957_v24 }
  0x8a   : > { %1137 = vmatpush1.bf16.msra.mxu1 %v5965_v25 }
  0x8b   : > { %1096 = vmatpush1.bf16.msra.mxu0 %v5971_v26  ;;  %1138 = vmatprep.subr.bf16.mxu1 %v5661_v1 }
  0x8c   : > { %1097 = vmatprep.subr.bf16.mxu0 %v5978_v27 }
  0x8e   : > { %1139 = vmatpush1.bf16.msra.mxu1 %v5989_v29 }
  0x8f   : > { %1098 = vmatpush1.bf16.msra.mxu0 %v5994_v30  ;;  %1140 = vmatprep.subr.bf16.mxu1 %v5661_v1 }
  0x90   : > { %4545 = vmatprep.subr.msk.bf16.mxu0 %vm889_vm1, %v6003_v32 }
  0x92   : > { %1141 = vmatpush1.bf16.msra.mxu1 %v6013_v34 }
  0x93   : > { %1100 = vmatpush1.bf16.msra.mxu0 %v6018_v36  ;;  %1213 = vmatprep.subr.bf16.mxu1 %v5661_v1 }
  0x94   : > { %1172 = vmatprep.subr.bf16.mxu0 %v5821_v0  ;;  %v6257_v0 = vld [vmem:[%s7592_s5 + $0x60] ss:$8 sps:$4 sm:$0xff]  }
  0x95   : > { %1155 = vmatmul.mubr.bf16.vlgmr.msra.gmra.mrb[8].mxu1 %v4543_v43 }
  0x96   : > { %1114 = vmatmul.mubr.bf16.vlgmr.msra.gmra.mrb[8].mxu0 %v4543_v43  ;;  %1214 = vmatpush1.bf16.msra.mxu1 %v5827_v2  ;;  %v6263_v2 = vld [vmem:[%s7592_s5 + $0x74] ss:$8 sps:$4 sm:$0xff]  }
  0x97   : > { %1173 = vmatpush1.bf16.msra.mxu0 %v5833_v3  ;;  %1215 = vmatprep.subr.bf16.mxu1 %v5661_v1  ;;  %v6269_v3 = vld [vmem:[%s7592_s5 + $0x70] ss:$8 sps:$4 sm:$0xff]  }
  0x98   : > { %1174 = vmatprep.subr.bf16.mxu0 %v5839_v4  ;;  %4551 = vmatprep.mubr.msk.bf16.mxu0 %vm885_vm0, %v4549_v44  ;;  %v6275_v4 = vld [vmem:[%s7592_s5 + $0x84] ss:$8 sps:$4 sm:$0xff]  }
  0x99   : > { %4552 = vmatprep.mubr.msk.bf16.mxu1 %vm885_vm0, %v4549_v44  ;;  %v6390_v44 = vld [vmem:[%s7593_s6 + $0x10] ss:$8 sps:$4 sm:$0xff]  }
  0x9a   : > { %1216 = vmatpush1.bf16.msra.mxu1 %v5846_v5  ;;  %v6281_v5 = vld [vmem:[%s7592_s5 + $0x80] ss:$8 sps:$4 sm:$0xff]  }
  0x9b   : > { %1175 = vmatpush1.bf16.msra.mxu0 %v5851_v6  ;;  %1217 = vmatprep.subr.bf16.mxu1 %v5661_v1  ;;  %v6287_v6 = vld [vmem:[%s7592_s5 + $0x94] ss:$8 sps:$4 sm:$0xff]  }
  0x9c   : > { %1176 = vmatprep.subr.bf16.mxu0 %v5857_v7  ;;  %v6293_v7 = vld [vmem:[%s7592_s5 + $0x90] ss:$8 sps:$4 sm:$0xff]  }
  0x9e   : > { %1218 = vmatpush1.bf16.msra.mxu1 %v5864_v8  ;;  %v6299_v8 = vld [vmem:[%s7592_s5 + $0xa4] ss:$8 sps:$4 sm:$0xff]  }
  0x9f   : > { %1177 = vmatpush1.bf16.msra.mxu0 %v5871_v9  ;;  %1219 = vmatprep.subr.bf16.mxu1 %v5661_v1  ;;  %v6305_v9 = vld [vmem:[%s7592_s5 + $0xa0] ss:$8 sps:$4 sm:$0xff]  }
  0xa0   : > { %1178 = vmatprep.subr.bf16.mxu0 %v5877_v10  ;;  %v6311_v10 = vld [vmem:[%s7592_s5 + $0xb4] ss:$8 sps:$4 sm:$0xff]  }
  0xa2   : > { %1220 = vmatpush1.bf16.msra.mxu1 %v5884_v11  ;;  %v6317_v11 = vld [vmem:[%s7592_s5 + $0xb0] ss:$8 sps:$4 sm:$0xff]  }
  0xa3   : > { %1179 = vmatpush1.bf16.msra.mxu0 %v5891_v12  ;;  %1221 = vmatprep.subr.bf16.mxu1 %v5661_v1  ;;  %v6323_v12 = vld [vmem:[%s7592_s5 + $0xc4] ss:$8 sps:$4 sm:$0xff]  }
  0xa4   : > { %1180 = vmatprep.subr.bf16.mxu0 %v5897_v13  ;;  %v6329_v13 = vld [vmem:[%s7592_s5 + $0xc0] ss:$8 sps:$4 sm:$0xff]  }
  0xa6   : > { %1222 = vmatpush1.bf16.msra.mxu1 %v5905_v14  ;;  %v6335_v14 = vld [vmem:[%s7592_s5 + $0xd4] ss:$8 sps:$4 sm:$0xff]  }
  0xa7   : > { %1181 = vmatpush1.bf16.msra.mxu0 %v5912_v15  ;;  %1223 = vmatprep.subr.bf16.mxu1 %v5661_v1  ;;  %v6341_v15 = vld [vmem:[%s7592_s5 + $0xd0] ss:$8 sps:$4 sm:$0xff]  }
  0xa8   : > { %1182 = vmatprep.subr.bf16.mxu0 %v5918_v16  ;;  %v6347_v16 = vld [vmem:[%s7592_s5 + $0xe4] ss:$8 sps:$4 sm:$0xff]  }
  0xaa   : > { %1224 = vmatpush1.bf16.msra.mxu1 %v5928_v17  ;;  %v6353_v17 = vld [vmem:[%s7592_s5 + $0xe0] ss:$8 sps:$4 sm:$0xff]  }
  0xab   : > { %1183 = vmatpush1.bf16.msra.mxu0 %v5935_v18  ;;  %1225 = vmatprep.subr.bf16.mxu1 %v5661_v1  ;;  %v6359_v18 = vld [vmem:[%s7592_s5 + $0xf4] ss:$8 sps:$4 sm:$0xff]  }
  0xac   : > { %1184 = vmatprep.subr.bf16.mxu0 %v5941_v19  ;;  %v6365_v19 = vld [vmem:[%s7592_s5 + $0xf0] ss:$8 sps:$4 sm:$0xff]  }
  0xae   : > { %1226 = vmatpush1.bf16.msra.mxu1 %v5946_v21 }
  0xaf   : > { %1185 = vmatpush1.bf16.msra.mxu0 %v5951_v22  ;;  %1227 = vmatprep.subr.bf16.mxu1 %v5661_v1 }
  0xb0   : > { %1186 = vmatprep.subr.bf16.mxu0 %v5957_v24 }
  0xb2   : > { %1228 = vmatpush1.bf16.msra.mxu1 %v5965_v25 }
  0xb3   : > { %1187 = vmatpush1.bf16.msra.mxu0 %v5971_v26  ;;  %1229 = vmatprep.subr.bf16.mxu1 %v5661_v1 }
  0xb4   : > { %1188 = vmatprep.subr.bf16.mxu0 %v5978_v27 }
  0xb6   : > { %1230 = vmatpush1.bf16.msra.mxu1 %v5989_v29 }
  0xb7   : > { %1189 = vmatpush1.bf16.msra.mxu0 %v5994_v30  ;;  %1231 = vmatprep.subr.bf16.mxu1 %v5661_v1 }
  0xb8   : > { %4550 = vmatprep.subr.msk.bf16.mxu0 %vm889_vm1, %v6003_v32 }
  0xba   : > { %1232 = vmatpush1.bf16.msra.mxu1 %v6013_v34 }
  0xbb   : > { %1191 = vmatpush1.bf16.msra.mxu0 %v6018_v36  ;;  %4587 = vmatprep.subr.msk.bf16.mxu1 %vm1501_vm2, %v6178_v50 }
  0xbc   : > { %1508 = vmatprep.subr.bf16.mxu0 %v6160_v45 }
  0xbd   : > { %1246 = vmatmul.mubr.bf16.vlgmr.msra.gmra.mrb[12].mxu1 %v4548_v46 }
  0xbe   : > { %1205 = vmatmul.mubr.bf16.vlgmr.msra.gmra.mrb[12].mxu0 %v4548_v46  ;;  %1581 = vmatprep.mubr.bf16.mxu1 %v5661_v1  ;;  %v6404_v46 = vld [vmem:[%s7593_s6 + $0x20] ss:$8 sps:$4 sm:$0xff]  }
  0xbf   : > { %1509 = vmatpush1.bf16.msra.mxu0 %v6167_v47  ;;  %1550 = vmatpush1.bf16.msra.mxu1 %v6196_v54 }
  0xc0   : > { %1510 = vmatprep.subr.bf16.mxu0 %v6173_v48  ;;  %1761 = vmatprep.subr.bf16.mxu1 %v6202_v55 }
  0xc3   : > { %1511 = vmatpush1.bf16.msra.mxu0 %v6185_v52 }
  0xc4   : > { %1512 = vmatprep.subr.bf16.mxu0 %v6191_v53 }
  0xc7   : > { %1513 = vmatpush1.bf16.msra.mxu0 %v6208_v56 }
  0xc8   : > { %1514 = vmatprep.subr.bf16.mxu0 %v6214_v57 }
  0xcb   : > { %1515 = vmatpush1.bf16.msra.mxu0 %v6221_v58 }
  0xcc   : > { %1516 = vmatprep.subr.bf16.mxu0 %v6227_v59 }
  0xcf   : > { %1517 = vmatpush1.bf16.msra.mxu0 %v6233_v60 }
  0xd0   : > { %1518 = vmatprep.subr.bf16.mxu0 %v6239_v61 }
  0xd3   : > { %1519 = vmatpush1.bf16.msra.mxu0 %v6245_v62 }
  0xd4   : > { %1520 = vmatprep.subr.bf16.mxu0 %v6251_v63 }
  0xd7   : > { %1521 = vmatpush1.bf16.msra.mxu0 %v6257_v0 }
  0xd8   : > { %1522 = vmatprep.subr.bf16.mxu0 %v6263_v2 }
  0xdb   : > { %1523 = vmatpush1.bf16.msra.mxu0 %v6269_v3 }
  0xdc   : > { %1524 = vmatprep.subr.bf16.mxu0 %v6275_v4 }
  0xdf   : > { %1525 = vmatpush1.bf16.msra.mxu0 %v6281_v5 }
  0xe0   : > { %1526 = vmatprep.subr.bf16.mxu0 %v6287_v6 }
  0xe3   : > { %1527 = vmatpush1.bf16.msra.mxu0 %v6293_v7 }
  0xe4   : > { %1528 = vmatprep.subr.bf16.mxu0 %v6299_v8 }
  0xe7   : > { %1529 = vmatpush1.bf16.msra.mxu0 %v6305_v9 }
  0xe8   : > { %1530 = vmatprep.subr.bf16.mxu0 %v6311_v10 }
  0xeb   : > { %1531 = vmatpush1.bf16.msra.mxu0 %v6317_v11 }
  0xec   : > { %1532 = vmatprep.subr.bf16.mxu0 %v6323_v12 }
  0xef   : > { %1533 = vmatpush1.bf16.msra.mxu0 %v6329_v13 }
  0xf0   : > { %1534 = vmatprep.subr.bf16.mxu0 %v6335_v14 }
  0xf3   : > { %1535 = vmatpush1.bf16.msra.mxu0 %v6341_v15 }
  0xf4   : > { %1536 = vmatprep.subr.bf16.mxu0 %v6347_v16 }
  0xf7   : > { %1537 = vmatpush1.bf16.msra.mxu0 %v6353_v17 }
  0xf8   : > { %1538 = vmatprep.subr.bf16.mxu0 %v6359_v18 }
  0xfb   : > { %1539 = vmatpush1.bf16.msra.mxu0 %v6365_v19 }
  0xfc   : > { %1865 = vmatprep.subr.bf16.mxu0 %v6160_v45  ;;  %v6396_v45 = vld [vmem:[%s7593_s6 + $0x24] ss:$8 sps:$4 sm:$0xff]  }
 0x118   : > { %v974_v20 = vpop.f32.mrb[0].mxu1 }
 0x119   : > { %v976_v21 = vpop.f32.mrb[1].mxu1  ;;  %v933_v22 = vpop.f32.mrb[0].mxu0 }
 0x11a   : > { %v977_v23 = vpop.f32.mrb[2].mxu1  ;;  %v935_v24 = vpop.f32.mrb[1].mxu0  ;;  %v6516_v21 = vld [vmem:[%s7593_s6 + $0xa0] ss:$8 sps:$4 sm:$0xff]  }
 0x11b   : > { %v978_v25 = vpop.f32.mrb[3].mxu1  ;;  %v937_v26 = vpop.f32.mrb[2].mxu0  ;;  %v6523_v23 = vld [vmem:[%s7593_s6 + $0xb4] ss:$8 sps:$4 sm:$0xff]  }
 0x11c   : > { %v938_v27 = vpop.f32.mrb[3].mxu0  ;;  %v6537_v26 = vld [vmem:[%s7593_s6 + $0xc4] ss:$8 sps:$4 sm:$0xff]  }
 0x11d   : > { %v6589_v27 = vld [vmem:[%s7593_s6 + $0xf0] ss:$8 sps:$4 sm:$0xff]  }
 0x140   : > { %v1065_v28 = vpop.f32.mrb[4].mxu1 }
 0x141   : > { %v1322_v29 = vmax.f32 %v974_v20, %v1065_v28  ;;  %v1024_v30 = vpop.f32.mrb[4].mxu0  ;;  %v1067_v31 = vpop.f32.mrb[5].mxu1 }
 0x142   : > { %v1320_v32 = vmax.f32 %v933_v22, %v1024_v30  ;;  %v1026_v33 = vpop.f32.mrb[5].mxu0  ;;  %v1068_v34 = vpop.f32.mrb[6].mxu1 }
 0x143   : > { %v6375_v36 = vpack.c.bf16 %v1322_v29, %v1322_v29  ;;  %v1321_v37 = vmax.f32 %v935_v24, %v1026_v33  ;;  %v1069_v38 = vpop.f32.mrb[7].mxu1  ;;  %v1028_v40 = vpop.f32.mrb[6].mxu0 }
 0x144   : > { %v6382_v41 = vpack.c.bf16 %v1320_v32, %v1320_v32  ;;  %v1029_v42 = vpop.f32.mrb[7].mxu0 }
 0x145   : > { %v1324_v43 = vpack.c.bf16 %v1321_v37, %v1321_v37  ;;  %4588 = vmatmul.mubr.msk.bf16.vlgmr.msra.gmra.mrb[16].mxu1 %vm1497_vm3, %v6375_v36 }
 0x146   : > { %1762 = vmatpush1.bf16.msra.mxu1 %v6373_v35 }
 0x147   : > { %1540 = vmatprep.mubr.bf16.mxu0 %v1324_v43  ;;  %1763 = vmatprep.subr.bf16.mxu1 %v6380_v39 }
 0x148   : > { %1541 = vmatmul.mubr.bf16.vlgmr.msra.gmra.mrb[16].mxu0 %v6382_v41  ;;  %1793 = vmatprep.mubr.bf16.mxu1 %v1324_v43 }
 0x149   : > { %1866 = vmatpush1.bf16.msra.mxu0 %v6167_v47  ;;  %v6418_v47 = vld [vmem:[%s7593_s6 + $0x30] ss:$8 sps:$4 sm:$0xff]  }
 0x14a   : > { %1764 = vmatpush1.bf16.msra.mxu1 %v6390_v44  ;;  %1867 = vmatprep.subr.bf16.mxu0 %v6173_v48  ;;  %v6425_v48 = vld [vmem:[%s7593_s6 + $0x44] ss:$8 sps:$4 sm:$0xff]  }
 0x14b   : > { %1765 = vmatprep.subr.bf16.mxu1 %v6396_v45 }
 0x14d   : > { %1868 = vmatpush1.bf16.msra.mxu0 %v6185_v52  ;;  %v6439_v52 = vld [vmem:[%s7593_s6 + $0x54] ss:$8 sps:$4 sm:$0xff]  }
 0x14e   : > { %1766 = vmatpush1.bf16.msra.mxu1 %v6404_v46  ;;  %1869 = vmatprep.subr.bf16.mxu0 %v6191_v53  ;;  %v6446_v53 = vld [vmem:[%s7593_s6 + $0x50] ss:$8 sps:$4 sm:$0xff]  }
 0x14f   : > { %1767 = vmatprep.subr.bf16.mxu1 %v6411_v49 }
 0x151   : > { %1870 = vmatpush1.bf16.msra.mxu0 %v6208_v56  ;;  %v6453_v56 = vld [vmem:[%s7593_s6 + $0x64] ss:$8 sps:$4 sm:$0xff]  }
 0x152   : > { %1768 = vmatpush1.bf16.msra.mxu1 %v6418_v47  ;;  %1871 = vmatprep.subr.bf16.mxu0 %v6214_v57  ;;  %v6460_v57 = vld [vmem:[%s7593_s6 + $0x60] ss:$8 sps:$4 sm:$0xff]  }
 0x153   : > { %1769 = vmatprep.subr.bf16.mxu1 %v6425_v48 }
 0x155   : > { %1872 = vmatpush1.bf16.msra.mxu0 %v6221_v58  ;;  %v6467_v58 = vld [vmem:[%s7593_s6 + $0x74] ss:$8 sps:$4 sm:$0xff]  }
 0x156   : > { %1770 = vmatpush1.bf16.msra.mxu1 %v6432_v51  ;;  %1873 = vmatprep.subr.bf16.mxu0 %v6227_v59  ;;  %v6474_v59 = vld [vmem:[%s7593_s6 + $0x70] ss:$8 sps:$4 sm:$0xff]  }
 0x157   : > { %1771 = vmatprep.subr.bf16.mxu1 %v6439_v52 }
 0x159   : > { %1874 = vmatpush1.bf16.msra.mxu0 %v6233_v60  ;;  %v6481_v60 = vld [vmem:[%s7593_s6 + $0x84] ss:$8 sps:$4 sm:$0xff]  }
 0x15a   : > { %1772 = vmatpush1.bf16.msra.mxu1 %v6446_v53  ;;  %1875 = vmatprep.subr.bf16.mxu0 %v6239_v61  ;;  %v6488_v61 = vld [vmem:[%s7593_s6 + $0x80] ss:$8 sps:$4 sm:$0xff]  }
 0x15b   : > { %1773 = vmatprep.subr.bf16.mxu1 %v6453_v56 }
 0x15d   : > { %1876 = vmatpush1.bf16.msra.mxu0 %v6245_v62  ;;  %v6495_v62 = vld [vmem:[%s7593_s6 + $0x94] ss:$8 sps:$4 sm:$0xff]  }
 0x15e   : > { %1774 = vmatpush1.bf16.msra.mxu1 %v6460_v57  ;;  %1877 = vmatprep.subr.bf16.mxu0 %v6251_v63  ;;  %v6502_v63 = vld [vmem:[%s7593_s6 + $0x90] ss:$8 sps:$4 sm:$0xff]  }
 0x15f   : > { %1775 = vmatprep.subr.bf16.mxu1 %v6467_v58 }
 0x161   : > { %1878 = vmatpush1.bf16.msra.mxu0 %v6257_v0  ;;  %v6509_v0 = vld [vmem:[%s7593_s6 + $0xa4] ss:$8 sps:$4 sm:$0xff]  }
 0x162   : > { %1776 = vmatpush1.bf16.msra.mxu1 %v6474_v59  ;;  %1879 = vmatprep.subr.bf16.mxu0 %v6263_v2 }
 0x163   : > { %1777 = vmatprep.subr.bf16.mxu1 %v6481_v60 }
 0x165   : > { %1880 = vmatpush1.bf16.msra.mxu0 %v6269_v3 }
 0x166   : > { %1778 = vmatpush1.bf16.msra.mxu1 %v6488_v61  ;;  %1881 = vmatprep.subr.bf16.mxu0 %v6275_v4 }
 0x167   : > { %1779 = vmatprep.subr.bf16.mxu1 %v6495_v62 }
 0x168   : > { %v1156_v2 = vpop.f32.mrb[8].mxu1 }
 0x169   : > { %1882 = vmatpush1.bf16.msra.mxu0 %v6281_v5  ;;  %v1115_v3 = vpop.f32.mrb[8].mxu0  ;;  %v1158_v20 = vpop.f32.mrb[9].mxu1 }
 0x16a   : > { %1780 = vmatpush1.bf16.msra.mxu1 %v6502_v63  ;;  %1883 = vmatprep.subr.bf16.mxu0 %v6287_v6  ;;  %v1117_v4 = vpop.f32.mrb[9].mxu0  ;;  %v1159_v22 = vpop.f32.mrb[10].mxu1  ;;  %v6530_v6 = vld [vmem:[%s7593_s6 + $0xb0] ss:$8 sps:$4 sm:$0xff]  }
 0x16b   : > { %1781 = vmatprep.subr.bf16.mxu1 %v6509_v0  ;;  %v1119_v5 = vpop.f32.mrb[10].mxu0  ;;  %v1160_v24 = vpop.f32.mrb[11].mxu1  ;;  %v2092_v22 = vld [vmem:[%s7597_s10] sm:$0xf] }
 0x16c   : > { %v1120_v25 = vpop.f32.mrb[11].mxu0 }
 0x16d   : > { %1884 = vmatpush1.bf16.msra.mxu0 %v6293_v7  ;;  %v6544_v7 = vld [vmem:[%s7593_s6 + $0xc0] ss:$8 sps:$4 sm:$0xff]  }
 0x16e   : > { %1782 = vmatpush1.bf16.msra.mxu1 %v6516_v21  ;;  %1885 = vmatprep.subr.bf16.mxu0 %v6299_v8  ;;  %v6551_v8 = vld [vmem:[%s7593_s6 + $0xd4] ss:$8 sps:$4 sm:$0xff]  }
 0x16f   : > { %1783 = vmatprep.subr.bf16.mxu1 %v6523_v23 }
 0x171   : > { %1886 = vmatpush1.bf16.msra.mxu0 %v6305_v9  ;;  %v6558_v9 = vld [vmem:[%s7593_s6 + $0xd0] ss:$8 sps:$4 sm:$0xff]  }
 0x172   : > { %1784 = vmatpush1.bf16.msra.mxu1 %v6530_v6  ;;  %1887 = vmatprep.subr.bf16.mxu0 %v6311_v10  ;;  %v6565_v10 = vld [vmem:[%s7593_s6 + $0xe4] ss:$8 sps:$4 sm:$0xff]  }
 0x173   : > { %1785 = vmatprep.subr.bf16.mxu1 %v6537_v26 }
 0x175   : > { %1888 = vmatpush1.bf16.msra.mxu0 %v6317_v11  ;;  %v6572_v11 = vld [vmem:[%s7593_s6 + $0xe0] ss:$8 sps:$4 sm:$0xff]  }
 0x176   : > { %1786 = vmatpush1.bf16.msra.mxu1 %v6544_v7  ;;  %1889 = vmatprep.subr.bf16.mxu0 %v6323_v12  ;;  %v6579_v12 = vld [vmem:[%s7593_s6 + $0xf4] ss:$8 sps:$4 sm:$0xff]  }
 0x177   : > { %1787 = vmatprep.subr.bf16.mxu1 %v6551_v8 }
 0x179   : > { %1890 = vmatpush1.bf16.msra.mxu0 %v6329_v13  ;;  %v1318_v13 = vld [vmem:[%s7593_s6 + $0x100] sm:$0x33] }
 0x17a   : > { %1788 = vmatpush1.bf16.msra.mxu1 %v6558_v9  ;;  %1891 = vmatprep.subr.bf16.mxu0 %v6335_v14  ;;  %v6593_v14 = vcombine.high %v1318_v13, %v1318_v13  ;;  %v4621_v28 = vcombine.low %v1318_v13, %v1318_v13 }
 0x17b   : > { %1789 = vmatprep.subr.bf16.mxu1 %v6565_v10 }
 0x17d   : > { %1892 = vmatpush1.bf16.msra.mxu0 %v6341_v15  ;;  %v1756_v15 = vsel %vm1501_vm2, %v4621_v28, 0 }
 0x17e   : > { %1790 = vmatpush1.bf16.msra.mxu1 %v6572_v11  ;;  %1893 = vmatprep.subr.bf16.mxu0 %v6347_v16 }
 0x17f   : > { %1791 = vmatprep.subr.bf16.mxu1 %v6579_v12 }
 0x181   : > { %1894 = vmatpush1.bf16.msra.mxu0 %v6353_v17 }
 0x182   : > { %1792 = vmatpush1.bf16.msra.mxu1 %v6589_v27  ;;  %1895 = vmatprep.subr.bf16.mxu0 %v6359_v18 }
 0x183   : > { %4623 = vmatprep.subr.msk.bf16.mxu1 %vm1501_vm2, %v6593_v14 }
 0x185   : > { %1794 = vmatmul.mubr.bf16.vlgmr.msra.gmra.mrb[20].mxu1 %v6382_v41  ;;  %1896 = vmatpush1.bf16.msra.mxu0 %v6365_v19 }
 0x186   : > { %1803 = vmatpush1.bf16.msra.mxu1 %v1756_v15  ;;  %1834 = vmatprep.mubr.bf16.mxu1 %v5661_v1 }
 0x187   : > { %1947 = vmatprep.subr.bf16.mxu1 %v6202_v55  ;;  %4625 = vmatprep.subr.msk.bf16.mxu0 %vm1501_vm2, %v6178_v50 }
 0x190   : > { %v1247_v16 = vpop.f32.mrb[12].mxu1 }
 0x191   : > { %4624 = vmatmul.mubr.msk.bf16.vlgmr.msra.gmra.mrb[20].mxu1 %vm1497_vm3, %v6375_v36  ;;  %v1206_v17 = vpop.f32.mrb[12].mxu0  ;;  %v1328_v18 = vmax.f32 %v1156_v2, %v1247_v16  ;;  %v1249_v29 = vpop.f32.mrb[13].mxu1 }
 0x192   : > { %1948 = vmatpush1.bf16.msra.mxu1 %v6373_v35  ;;  %v1326_v30 = vmax.f32 %v1115_v3, %v1206_v17  ;;  %v1208_v31 = vpop.f32.mrb[13].mxu0  ;;  %v1250_v19 = vpop.f32.mrb[14].mxu1  ;;  %v2188_v17 = vld [vmem:[%s7598_s11] sm:$0xf]  ;;  %v5401_v29 = vld [vmem:[%s7595_s8 + $0x9c] ss:$8 sps:$4 sm:$0xff]  }
 0x193   : > { %v1327_v32 = vmax.f32 %v1117_v4, %v1208_v31  ;;  %1949 = vmatprep.subr.bf16.mxu1 %v6380_v39  ;;  %v1210_v33 = vpop.f32.mrb[14].mxu0  ;;  %v1251_v55 = vpop.f32.mrb[15].mxu1  ;;  %v1331_v35 = vpack.c.bf16 %v1328_v18, %v1328_v18  ;;  %v2037_v4 = vld [vmem:[%s7596_s9] sm:$0xf]  ;;  %v5396_v18 = vld [vmem:[%s7595_s8 + $0x88] ss:$8 sps:$4 sm:$0xff]  }
 0x194   : > { %v1329_v34 = vpack.c.bf16 %v1326_v30, %v1326_v30  ;;  %v1211_v37 = vpop.f32.mrb[15].mxu0  ;;  %v5399_v30 = vld [vmem:[%s7595_s8 + $0x98] ss:$8 sps:$4 sm:$0xff]   ;;  %v5404_v31 = vld [vmem:[%s7595_s8 + $0xac] ss:$8 sps:$4 sm:$0xff]  }
 0x195   : > { %v1330_v50 = vpack.c.bf16 %v1327_v32, %v1327_v32  ;;  %v5402_v19 = vld [vmem:[%s7595_s8 + $0xa8] ss:$8 sps:$4 sm:$0xff]   ;;  %v5407_v32 = vld [vmem:[%s7595_s8 + $0xbc] ss:$8 sps:$4 sm:$0xff]   ;;  %v5405_v33 = vld [vmem:[%s7595_s8 + $0xb8] ss:$8 sps:$4 sm:$0xff]  }
 0x196   : > { %1950 = vmatpush1.bf16.msra.mxu1 %v6390_v44  ;;  %v5410_v55 = vld [vmem:[%s7595_s8 + $0xcc] ss:$8 sps:$4 sm:$0xff]   ;;  %v5413_v37 = vld [vmem:[%s7595_s8 + $0xdc] ss:$8 sps:$4 sm:$0xff]  }
 0x197   : > { %1897 = vmatprep.mubr.bf16.mxu0 %v1330_v50  ;;  %1951 = vmatprep.subr.bf16.mxu1 %v6396_v45 }
 0x198   : > { %1898 = vmatmul.mubr.bf16.vlgmr.msra.gmra.mrb[20].mxu0 %v1329_v34  ;;  %1979 = vmatprep.mubr.bf16.mxu1 %v1330_v50  ;;  %v5411_v50 = vld [vmem:[%s7595_s8 + $0xd8] ss:$8 sps:$4 sm:$0xff]  }
 0x199   : > { %1907 = vmatpush1.bf16.msra.mxu0 %v6196_v54  ;;  %1938 = vmatprep.mubr.bf16.mxu0 %v5661_v1 }
 0x19a   : > { %1952 = vmatpush1.bf16.msra.mxu1 %v6404_v46  ;;  %v1846_v46 = vlaneseq }
 0x19b   : > { %1953 = vmatprep.subr.bf16.mxu1 %v6411_v49 }
 0x19c   : > { %v1847_v49 = vshrl.u32 %v1846_v46, 7  ;;  %v5425_v46 = vld [vmem:[%s7595_s8 + $0x10] ss:$8 sps:$4 sm:$0xff]  }
 0x19e   : > { %1954 = vmatpush1.bf16.msra.mxu1 %v6418_v47  ;;  %v1848_v47 = vsub.s32 0, %v1847_v49 }
 0x19f   : > { %1955 = vmatprep.subr.bf16.mxu1 %v6425_v48  ;;  %v1319_v48 = vld [vmem:[%s7594_s7] sm:$0x3] }
 0x1a2   : > { %1956 = vmatpush1.bf16.msra.mxu1 %v6432_v51  ;;  %v1852_v51 = vsub.s32 1, %v1847_v49  ;;  %v5430_v49 = vld [vmem:[%s7595_s8 + $0x24] ss:$8 sps:$4 sm:$0xff]  }
 0x1a3   : > { %1957 = vmatprep.subr.bf16.mxu1 %v6439_v52  ;;  %v1849_v52 = vrot.slane %v1319_v48, %v1848_v47  ;;  %v5428_v47 = vld [vmem:[%s7595_s8 + $0x20] ss:$8 sps:$4 sm:$0xff]  }
 0x1a4   : > { %4626 = vmatmul.mubr.msk.bf16.vlgmr.msra.gmra.mrb[20].mxu0 %vm1497_vm3, %v1331_v35 }
 0x1a5   : > { %2081 = vmatprep.mubr.bf16.mxu0 %v5661_v1 }
 0x1a6   : > { %1958 = vmatpush1.bf16.msra.mxu1 %v6446_v53 }
 0x1a7   : > { %1959 = vmatprep.subr.bf16.mxu1 %v6453_v56  ;;  %v1853_v56 = vrot.slane %v1319_v48, %v1852_v51  ;;  %v5433_v48 = vld [vmem:[%s7595_s8 + $0x34] ss:$8 sps:$4 sm:$0xff]   ;;  %v5431_v51 = vld [vmem:[%s7595_s8 + $0x30] ss:$8 sps:$4 sm:$0xff]  }
 0x1aa   : > { %1960 = vmatpush1.bf16.msra.mxu1 %v6460_v57 }
 0x1ab   : > { %1961 = vmatprep.subr.bf16.mxu1 %v6467_v58 }
 0x1ae   : > { %1962 = vmatpush1.bf16.msra.mxu1 %v6474_v59 }
 0x1af   : > { %1963 = vmatprep.subr.bf16.mxu1 %v6481_v60 }
 0x1b2   : > { %1964 = vmatpush1.bf16.msra.mxu1 %v6488_v61 }
 0x1b3   : > { %1965 = vmatprep.subr.bf16.mxu1 %v6495_v62 }
 0x1b6   : > { %1966 = vmatpush1.bf16.msra.mxu1 %v6502_v63 }
 0x1b7   : > { %1967 = vmatprep.subr.bf16.mxu1 %v6509_v0 }
 0x1ba   : > { %1968 = vmatpush1.bf16.msra.mxu1 %v6516_v21 }
 0x1bb   : > { %1969 = vmatprep.subr.bf16.mxu1 %v6523_v23 }
 0x1be   : > { %1970 = vmatpush1.bf16.msra.mxu1 %v6530_v6 }
 0x1bf   : > { %1971 = vmatprep.subr.bf16.mxu1 %v6537_v26 }
 0x1c2   : > { %1972 = vmatpush1.bf16.msra.mxu1 %v6544_v7 }
 0x1c3   : > { %1973 = vmatprep.subr.bf16.mxu1 %v6551_v8 }
 0x1c6   : > { %1974 = vmatpush1.bf16.msra.mxu1 %v6558_v9 }
 0x1c7   : > { %1975 = vmatprep.subr.bf16.mxu1 %v6565_v10 }
 0x1ca   : > { %1976 = vmatpush1.bf16.msra.mxu1 %v6572_v11 }
 0x1cb   : > { %1977 = vmatprep.subr.bf16.mxu1 %v6579_v12 }
 0x1ce   : > { %1978 = vmatpush1.bf16.msra.mxu1 %v6589_v27 }
 0x1cf   : > { %4627 = vmatprep.subr.msk.bf16.mxu1 %vm1501_vm2, %v6593_v14 }
 0x1d1   : > { %1980 = vmatmul.mubr.bf16.vlgmr.msra.gmra.mrb[24].mxu1 %v1329_v34  ;;  %v5408_v34 = vld [vmem:[%s7595_s8 + $0xc8] ss:$8 sps:$4 sm:$0xff]  }
 0x1d2   : > { %1989 = vmatpush1.bf16.msra.mxu1 %v1756_v15  ;;  %2020 = vmatprep.mubr.bf16.mxu1 %v5661_v1  ;;  %v5398_v15 = vld [vmem:[%s7595_s8 + $0x8c] ss:$8 sps:$4 sm:$0xff]  }
 0x1dd   : > { %4628 = vmatmul.mubr.msk.bf16.vlgmr.msra.gmra.mrb[24].mxu1 %vm1497_vm3, %v1331_v35  ;;  %v5416_v35 = vld [vmem:[%s7595_s8 + $0xec] ss:$8 sps:$4 sm:$0xff]  }
 0x1de   : > { %2128 = vmatprep.mubr.bf16.mxu1 %v5661_v1 }
 0x218   : > { %v1583_v54 = vpop.f32.mrb[16].mxu1 }
 0x219   : > { %v1585_v36 = vpop.f32.mrb[17].mxu1 }
 0x21a   : > { %v1587_v38 = vpop.f32.mrb[18].mxu1 }
 0x21b   : > { %v1542_v39 = vpop.f32.mrb[16].mxu0  ;;  %v1588_v40 = vpop.f32.mrb[19].mxu1  ;;  %v4653_v38 = vld [vmem:[%s7595_s8 + $0x108] sm:$0x11] }
 0x21c   : > { %v1584_v41 = vadd.f32 %v1583_v54, %v1542_v39  ;;  %v1544_v42 = vpop.f32.mrb[17].mxu0  ;;  %v5414_v54 = vld [vmem:[%s7595_s8 + $0xe8] ss:$8 sps:$4 sm:$0xff]   ;;  %v5417_v39 = vld [vmem:[%s7595_s8 + $0xf8] ss:$8 sps:$4 sm:$0xff]   ;;  %v4671_v40 = vcombine.high %v4653_v38, %v4653_v38 }
 0x21d   : > { %v1586_v43 = vadd.f32 %v1585_v36, %v1544_v42  ;;  %v1546_v44 = vpop.f32.mrb[18].mxu0  ;;  %v5419_v36 = vld [vmem:[%s7595_s8 + $0xfc] ss:$8 sps:$4 sm:$0xff]  }
 0x21e   : > { %v1547_v45 = vpop.f32.mrb[19].mxu0  ;;  %v5422_v44 = vld [vmem:[%s7595_s8] ss:$8 sps:$4 sm:$0xff]  }
 0x21f   : > { %v5427_v45 = vld [vmem:[%s7595_s8 + $0x14] ss:$8 sps:$4 sm:$0xff]  }
 0x264   : > { %v1836_v53 = vpop.f32.mrb[20].mxu1 }
 0x265   : > { %v1843_v57 = vmax.f32 %v1584_v41, %v1836_v53  ;;  %v1838_v58 = vpop.f32.mrb[21].mxu1  ;;  %v4670_v41 = vcombine.low %v4653_v38, %v4653_v38  ;;  %v5434_v53 = vld [vmem:[%s7595_s8 + $0x40] ss:$8 sps:$4 sm:$0xff]   ;;  %v6957_v38 = vld [vmem:[%s7595_s8 + $0x1cc] ss:$8 sps:$4 sm:$0xff]  }
 0x266   : > { %v1844_v59 = vmax.f32 %v1586_v43, %v1838_v58  ;;  %v1840_v60 = vpop.f32.mrb[22].mxu1  ;;  %v5424_v43 = vld [vmem:[%s7595_s8 + $0x4] ss:$8 sps:$4 sm:$0xff]  }
 0x267   : > { %v1856_v61 = vadd.f32 %v1849_v52, %v1843_v57  ;;  %v1841_v62 = vpop.f32.mrb[23].mxu1  ;;  %v2360_v42 = vsel %vm2358_vm7, %v4670_v41, 0  ;;  %v5437_v57 = vld [vmem:[%s7595_s8 + $0x50] ss:$8 sps:$4 sm:$0xff]   ;;  %v5442_v58 = vld [vmem:[%s7595_s8 + $0x64] ss:$8 sps:$4 sm:$0xff]  }
 0x268   : > { %v1857_v63 = vadd.f32 %v1853_v56, %v1844_v59  ;;  %v5440_v59 = vld [vmem:[%s7595_s8 + $0x60] ss:$8 sps:$4 sm:$0xff]   ;;  %v5445_v60 = vld [vmem:[%s7595_s8 + $0x74] ss:$8 sps:$4 sm:$0xff]   ;;  %v5443_v62 = vld [vmem:[%s7595_s8 + $0x70] ss:$8 sps:$4 sm:$0xff]  }
 0x269   : > { %v1858_v0 = vmax.f32 %v1856_v61, 0.0  ;;  %v2251_v61 = vld [vmem:[%s7595_s8 + $0x80] sm:$0x11] }
 0x26a   : > { %v1859_v2 = vmax.f32 %v1857_v63, 0.0  ;;  %v4691_v63 = vcombine.high %v2251_v61, %v2251_v61  ;;  %v6975_v41 = vld [vmem:[%s7595_s8 + $0x1d8] ss:$8 sps:$4 sm:$0xff]  }
 0x26b   : > { %v6652_v3 = vpack.c.bf16 %v1858_v0, %v1858_v0  ;;  %v4690_v0 = vcombine.low %v2251_v61, %v2251_v61 }
 0x26c   : > { %v6654_v20 = vpack.c.bf16 %v1859_v2, %v1859_v2 }
 0x26d   : > { %v2044_v21 = vsel %vm2042_vm4, %v6652_v3, 0  ;;  %v2495_v2 = vsel %vm2358_vm7, %v4690_v0, 0  ;;  %v7039_v0 = vld [vmem:[%s7595_s8 + $0x220] ss:$8 sps:$4 sm:$0xff]  }
 0x26e   : > { %4629 = vmatprep.subr.msk.bf16.mxu0 %vm2042_vm4, %v6654_v20  ;;  %4631 = vmatprep.subr.msk.bf16.mxu1 %vm2042_vm4, %v6654_v20 }
 0x26f   : > { %2050 = vmatpush1.bf16.msra.mxu0 %v2044_v21  ;;  %2097 = vmatpush1.bf16.msra.mxu1 %v2044_v21  ;;  %v6809_v21 = vld [vmem:[%s7595_s8 + $0x110] ss:$8 sps:$4 sm:$0xff]  }
 0x272   : > { %4630 = vmatmul.mubr.msk.bf16.vlgmr.msra.gmra.mrb[24].mxu0 %vm2038_vm5, %v2037_v4  ;;  %4632 = vmatmul.mubr.msk.bf16.vlgmr.msra.gmra.mrb[28].mxu1 %vm2038_vm5, %v2092_v22  ;;  %v6821_v22 = vld [vmem:[%s7595_s8 + $0x120] ss:$8 sps:$4 sm:$0xff]  }
 0x273   : > { %2177 = vmatprep.mubr.bf16.mxu0 %v5661_v1  ;;  %2224 = vmatprep.mubr.bf16.mxu1 %v5661_v1 }
 0x277   : > { %v1940_v23 = vpop.f32.mrb[20].mxu0 }
 0x278   : > { %v1942_v5 = vpop.f32.mrb[21].mxu0 }
 0x279   : > { %v1944_v24 = vpop.f32.mrb[22].mxu0 }
 0x27a   : > { %v1945_v25 = vpop.f32.mrb[23].mxu0  ;;  %v6845_v24 = vld [vmem:[%s7595_s8 + $0x140] ss:$8 sps:$4 sm:$0xff]  }
 0x27b   : > { %v6851_v25 = vld [vmem:[%s7595_s8 + $0x154] ss:$8 sps:$4 sm:$0xff]  }
 0x2b0   : > { %v2022_v6 = vpop.f32.mrb[24].mxu1 }
 0x2b1   : > { %v2029_v26 = vmax.f32 %v1940_v23, %v2022_v6  ;;  %v2024_v7 = vpop.f32.mrb[25].mxu1  ;;  %v6827_v23 = vld [vmem:[%s7595_s8 + $0x134] ss:$8 sps:$4 sm:$0xff]   ;;  %v6857_v6 = vld [vmem:[%s7595_s8 + $0x150] ss:$8 sps:$4 sm:$0xff]  }
 0x2b2   : > { %v2030_v8 = vmax.f32 %v1942_v5, %v2024_v7  ;;  %v2026_v9 = vpop.f32.mrb[26].mxu1  ;;  %v6839_v5 = vld [vmem:[%s7595_s8 + $0x144] ss:$8 sps:$4 sm:$0xff]   ;;  %v6869_v7 = vld [vmem:[%s7595_s8 + $0x160] ss:$8 sps:$4 sm:$0xff]  }
 0x2b3   : > { %v2031_v10 = vadd.f32 %v2029_v26, %v1849_v52  ;;  %v2027_v11 = vpop.f32.mrb[27].mxu1  ;;  %v5436_v52 = vld [vmem:[%s7595_s8 + $0x44] ss:$8 sps:$4 sm:$0xff]   ;;  %v6881_v9 = vld [vmem:[%s7595_s8 + $0x170] ss:$8 sps:$4 sm:$0xff]  }
 0x2b4   : > { %v2032_v12 = vadd.f32 %v2030_v8, %v1853_v56  ;;  %v5439_v56 = vld [vmem:[%s7595_s8 + $0x54] ss:$8 sps:$4 sm:$0xff]   ;;  %v6863_v26 = vld [vmem:[%s7595_s8 + $0x164] ss:$8 sps:$4 sm:$0xff]  }
 0x2b5   : > { %v2033_v13 = vmax.f32 %v2031_v10, 0.0  ;;  %v6875_v8 = vld [vmem:[%s7595_s8 + $0x174] ss:$8 sps:$4 sm:$0xff]   ;;  %v6887_v10 = vld [vmem:[%s7595_s8 + $0x184] ss:$8 sps:$4 sm:$0xff]  }
 0x2b6   : > { %v2034_v27 = vmax.f32 %v2032_v12, 0.0  ;;  %v4710_v11 = vld [vmem:[%s7595_s8 + $0x190] sm:$0x11]  ;;  %v6896_v12 = vld [vmem:[%s7595_s8 + $0x180] ss:$8 sps:$4 sm:$0xff]  }
 0x2b7   : > { %v6672_v14 = vpack.c.bf16 %v2033_v13, %v2033_v13  ;;  %v6899_v13 = vcombine.high %v4710_v11, %v4710_v11 }
 0x2b8   : > { %v6674_v28 = vpack.c.bf16 %v2034_v27, %v2034_v27  ;;  %v4727_v27 = vcombine.low %v4710_v11, %v4710_v11 }
 0x2b9   : > { %v2140_v16 = vsel %vm2042_vm4, %v6672_v14, 0 }
 0x2ba   : > { %4633 = vmatprep.subr.msk.bf16.mxu0 %vm2042_vm4, %v6674_v28  ;;  %4635 = vmatprep.subr.msk.bf16.mxu1 %vm2042_vm4, %v6674_v28 }
 0x2bb   : > { %2146 = vmatpush1.bf16.msra.mxu0 %v2140_v16  ;;  %2193 = vmatpush1.bf16.msra.mxu1 %v2140_v16  ;;  %v6910_v16 = vld [vmem:[%s7595_s8 + $0x19c] ss:$8 sps:$4 sm:$0xff]  }
 0x2bc   : > { %2365 = vmatprep.subr.bf16.mxu0 %v5398_v15  ;;  %3005 = vmatprep.subr.bf16.mxu1 %v5398_v15  ;;  %v6905_v15 = vsel %vm2358_vm7, %v4727_v27, 0 }
 0x2be   : > { %4634 = vmatmul.mubr.msk.bf16.vlgmr.msra.gmra.mrb[28].mxu0 %vm2038_vm5, %v2037_v4  ;;  %4636 = vmatmul.mubr.msk.bf16.vlgmr.msra.gmra.mrb[32].mxu1 %vm2038_vm5, %v2188_v17  ;;  %v6814_v4 = vld [vmem:[%s7595_s8 + $0x124] ss:$8 sps:$4 sm:$0xff]  }
 0x2bf   : > { %2366 = vmatpush1.bf16.msra.mxu0 %v5396_v18  ;;  %4673 = vmatprep.mubr.msk.bf16.mxu0 %vm2355_vm6, %v6654_v20 }
 0x2c0   : > { %3006 = vmatpush1.bf16.msra.mxu1 %v5396_v18  ;;  %4806 = vmatprep.mubr.msk.bf16.mxu1 %vm2355_vm6, %v6674_v28 }
 0x2c1   : > { %2367 = vmatprep.subr.bf16.mxu0 %v5401_v29  ;;  %3007 = vmatprep.subr.bf16.mxu1 %v5401_v29 }
 0x2c3   : > { %2368 = vmatpush1.bf16.msra.mxu0 %v5399_v30 }
 0x2c4   : > { %3008 = vmatpush1.bf16.msra.mxu1 %v5399_v30  ;;  %2369 = vmatprep.subr.bf16.mxu0 %v5404_v31 }
 0x2c5   : > { %3009 = vmatprep.subr.bf16.mxu1 %v5404_v31 }
 0x2c7   : > { %2370 = vmatpush1.bf16.msra.mxu0 %v5402_v19 }
 0x2c8   : > { %3010 = vmatpush1.bf16.msra.mxu1 %v5402_v19  ;;  %2371 = vmatprep.subr.bf16.mxu0 %v5407_v32 }
 0x2c9   : > { %3011 = vmatprep.subr.bf16.mxu1 %v5407_v32  ;;  %v6925_v32 = vld [vmem:[%s7595_s8 + $0x198] ss:$8 sps:$4 sm:$0xff]  }
 0x2cb   : > { %2372 = vmatpush1.bf16.msra.mxu0 %v5405_v33 }
 0x2cc   : > { %3012 = vmatpush1.bf16.msra.mxu1 %v5405_v33  ;;  %2373 = vmatprep.subr.bf16.mxu0 %v5410_v55 }
 0x2cd   : > { %3013 = vmatprep.subr.bf16.mxu1 %v5410_v55 }
 0x2cf   : > { %2374 = vmatpush1.bf16.msra.mxu0 %v5408_v34 }
 0x2d0   : > { %3014 = vmatpush1.bf16.msra.mxu1 %v5408_v34  ;;  %2375 = vmatprep.subr.bf16.mxu0 %v5413_v37  ;;  %v6930_v34 = vld [vmem:[%s7595_s8 + $0x1ac] ss:$8 sps:$4 sm:$0xff]  }
 0x2d1   : > { %3015 = vmatprep.subr.bf16.mxu1 %v5413_v37 }
 0x2d3   : > { %2376 = vmatpush1.bf16.msra.mxu0 %v5411_v50 }
 0x2d4   : > { %3016 = vmatpush1.bf16.msra.mxu1 %v5411_v50  ;;  %2377 = vmatprep.subr.bf16.mxu0 %v5416_v35 }
 0x2d5   : > { %3017 = vmatprep.subr.bf16.mxu1 %v5416_v35  ;;  %v6939_v35 = vld [vmem:[%s7595_s8 + $0x1a8] ss:$8 sps:$4 sm:$0xff]  }
 0x2d7   : > { %2378 = vmatpush1.bf16.msra.mxu0 %v5414_v54 }
 0x2d8   : > { %3018 = vmatpush1.bf16.msra.mxu1 %v5414_v54  ;;  %2379 = vmatprep.subr.bf16.mxu0 %v5419_v36  ;;  %v6945_v54 = vld [vmem:[%s7595_s8 + $0x1bc] ss:$8 sps:$4 sm:$0xff]  }
 0x2d9   : > { %3019 = vmatprep.subr.bf16.mxu1 %v5419_v36  ;;  %v6951_v36 = vld [vmem:[%s7595_s8 + $0x1b8] ss:$8 sps:$4 sm:$0xff]  }
 0x2db   : > { %2380 = vmatpush1.bf16.msra.mxu0 %v5417_v39 }
 0x2dc   : > { %3020 = vmatpush1.bf16.msra.mxu1 %v5417_v39  ;;  %4672 = vmatprep.subr.msk.bf16.mxu0 %vm2358_vm7, %v4671_v40  ;;  %v6963_v39 = vld [vmem:[%s7595_s8 + $0x1c8] ss:$8 sps:$4 sm:$0xff]  }
 0x2dd   : > { %4805 = vmatprep.subr.msk.bf16.mxu1 %vm2358_vm7, %v4671_v40  ;;  %v6969_v40 = vld [vmem:[%s7595_s8 + $0x1dc] ss:$8 sps:$4 sm:$0xff]  }
 0x2df   : > { %2382 = vmatpush1.bf16.msra.mxu0 %v2360_v42 }
 0x2e0   : > { %3022 = vmatpush1.bf16.msra.mxu1 %v2360_v42  ;;  %2500 = vmatprep.subr.bf16.mxu0 %v5424_v43  ;;  %v6981_v42 = vld [vmem:[%s7595_s8 + $0x1ec] ss:$8 sps:$4 sm:$0xff]  }
 0x2e1   : > { %3046 = vmatprep.subr.bf16.mxu1 %v5424_v43  ;;  %v6987_v43 = vld [vmem:[%s7595_s8 + $0x1e8] ss:$8 sps:$4 sm:$0xff]  }
 0x2e2   : > { %2398 = vmatmul.mubr.bf16.vlgmr.msra.gmra.mrb[32].mxu0 %v6652_v3 }
 0x2e3   : > { %3038 = vmatmul.mubr.bf16.vlgmr.msra.gmra.mrb[36].mxu1 %v6672_v14  ;;  %2501 = vmatpush1.bf16.msra.mxu0 %v5422_v44 }
 0x2e4   : > { %3047 = vmatpush1.bf16.msra.mxu1 %v5422_v44  ;;  %4808 = vmatprep.mubr.msk.bf16.mxu1 %vm2355_vm6, %v6654_v20  ;;  %v5450_v20 = vld [vmem:[%s7595_s8 + $0x114] ss:$8 sps:$4 sm:$0xff]  }
 0x2e5   : > { %3048 = vmatprep.subr.bf16.mxu1 %v5427_v45  ;;  %2502 = vmatprep.subr.bf16.mxu0 %v5427_v45  ;;  %v6993_v44 = vld [vmem:[%s7595_s8 + $0x1fc] ss:$8 sps:$4 sm:$0xff]   ;;  %v6999_v45 = vld [vmem:[%s7595_s8 + $0x1f8] ss:$8 sps:$4 sm:$0xff]  }
 0x2e7   : > { %2503 = vmatpush1.bf16.msra.mxu0 %v5425_v46 }
 0x2e8   : > { %3049 = vmatpush1.bf16.msra.mxu1 %v5425_v46  ;;  %2504 = vmatprep.subr.bf16.mxu0 %v5430_v49  ;;  %v7005_v46 = vld [vmem:[%s7595_s8 + $0x20c] ss:$8 sps:$4 sm:$0xff]  }
 0x2e9   : > { %3050 = vmatprep.subr.bf16.mxu1 %v5430_v49  ;;  %v4747_v49 = vld [vmem:[%s7595_s8 + $0x218] sm:$0x11] }
 0x2eb   : > { %2505 = vmatpush1.bf16.msra.mxu0 %v5428_v47 }
 0x2ec   : > { %3051 = vmatpush1.bf16.msra.mxu1 %v5428_v47  ;;  %2506 = vmatprep.subr.bf16.mxu0 %v5433_v48  ;;  %v7014_v47 = vld [vmem:[%s7595_s8 + $0x208] ss:$8 sps:$4 sm:$0xff]  }
 0x2ed   : > { %3052 = vmatprep.subr.bf16.mxu1 %v5433_v48  ;;  %v7017_v48 = vcombine.high %v4747_v49, %v4747_v49 }
 0x2ef   : > { %2507 = vmatpush1.bf16.msra.mxu0 %v5431_v51 }
 0x2f0   : > { %3053 = vmatpush1.bf16.msra.mxu1 %v5431_v51  ;;  %2508 = vmatprep.subr.bf16.mxu0 %v5436_v52  ;;  %v4764_v51 = vcombine.low %v4747_v49, %v4747_v49  ;;  %v5550_v49 = vld [vmem:[%s7599_s12 + $0x60] sm:$0xff]  }
 0x2f1   : > { %3054 = vmatprep.subr.bf16.mxu1 %v5436_v52 }
 0x2f2   : > { %v7023_v52 = vsel %vm2358_vm7, %v4764_v51, 0  ;;  %v5553_v51 = vld [vmem:[%s7600_s13 + $0x68] sm:$0x3f]  }
 0x2f3   : > { %2509 = vmatpush1.bf16.msra.mxu0 %v5434_v53 }
 0x2f4   : > { %3055 = vmatpush1.bf16.msra.mxu1 %v5434_v53  ;;  %2510 = vmatprep.subr.bf16.mxu0 %v5439_v56  ;;  %v7028_v53 = vld [vmem:[%s7595_s8 + $0x224] ss:$8 sps:$4 sm:$0xff]  }
 0x2f5   : > { %3056 = vmatprep.subr.bf16.mxu1 %v5439_v56 }
 0x2f7   : > { %2511 = vmatpush1.bf16.msra.mxu0 %v5437_v57 }
 0x2f8   : > { %3057 = vmatpush1.bf16.msra.mxu1 %v5437_v57  ;;  %2512 = vmatprep.subr.bf16.mxu0 %v5442_v58 }
 0x2f9   : > { %3058 = vmatprep.subr.bf16.mxu1 %v5442_v58 }
 0x2fb   : > { %2513 = vmatpush1.bf16.msra.mxu0 %v5440_v59 }
 0x2fc   : > { %3059 = vmatpush1.bf16.msra.mxu1 %v5440_v59  ;;  %2514 = vmatprep.subr.bf16.mxu0 %v5445_v60 }
 0x2fd   : > { %3060 = vmatprep.subr.bf16.mxu1 %v5445_v60 }
 0x2ff   : > { %2515 = vmatpush1.bf16.msra.mxu0 %v5443_v62 }
 0x300   : > { %3061 = vmatpush1.bf16.msra.mxu1 %v5443_v62  ;;  %4692 = vmatprep.subr.msk.bf16.mxu0 %vm2358_vm7, %v4691_v63 }
 0x301   : > { %4807 = vmatprep.subr.msk.bf16.mxu1 %vm2358_vm7, %v4691_v63 }
 0x303   : > { %2517 = vmatpush1.bf16.msra.mxu0 %v2495_v2 }
 0x304   : > { %3063 = vmatpush1.bf16.msra.mxu1 %v2495_v2  ;;  %2652 = vmatprep.subr.bf16.mxu0 %v5450_v20 }
 0x305   : > { %3087 = vmatprep.subr.bf16.mxu1 %v5450_v20 }
 0x307   : > { %3079 = vmatmul.mubr.bf16.vlgmr.msra.gmra.mrb[36].mxu1 %v6652_v3  ;;  %v6833_v3 = vld [vmem:[%s7595_s8 + $0x130] ss:$8 sps:$4 sm:$0xff]  }
 0x308   : > { %3088 = vmatpush1.bf16.msra.mxu1 %v6809_v21 }
 0x309   : > { %3089 = vmatprep.subr.bf16.mxu1 %v6814_v4 }
 0x30c   : > { %3090 = vmatpush1.bf16.msra.mxu1 %v6821_v22 }
 0x30d   : > { %3091 = vmatprep.subr.bf16.mxu1 %v6827_v23 }
 0x310   : > { %3092 = vmatpush1.bf16.msra.mxu1 %v6833_v3 }
 0x311   : > { %3093 = vmatprep.subr.bf16.mxu1 %v6839_v5 }
 0x314   : > { %3094 = vmatpush1.bf16.msra.mxu1 %v6845_v24 }
 0x315   : > { %3095 = vmatprep.subr.bf16.mxu1 %v6851_v25 }
 0x318   : > { %3096 = vmatpush1.bf16.msra.mxu1 %v6857_v6 }
 0x319   : > { %3097 = vmatprep.subr.bf16.mxu1 %v6863_v26 }
 0x31c   : > { %3098 = vmatpush1.bf16.msra.mxu1 %v6869_v7 }
 0x31d   : > { %3099 = vmatprep.subr.bf16.mxu1 %v6875_v8 }
 0x320   : > { %3100 = vmatpush1.bf16.msra.mxu1 %v6881_v9 }
 0x321   : > { %3101 = vmatprep.subr.bf16.mxu1 %v6887_v10 }
 0x324   : > { %3102 = vmatpush1.bf16.msra.mxu1 %v6896_v12 }
 0x325   : > { %4809 = vmatprep.subr.msk.bf16.mxu1 %vm2358_vm7, %v6899_v13 }
 0x328   : > { %3104 = vmatpush1.bf16.msra.mxu1 %v6905_v15 }
 0x329   : > { %3130 = vmatprep.subr.bf16.mxu1 %v6910_v16 }
 0x345   : > { %v2083_v17 = vpop.f32.mrb[24].mxu0  ;;  %v6914_v18 = vpop.f32.mrb[28].mxu1 }
 0x346   : > { %v6916_v29 = vpack.c.bf16 %v2083_v17, %v2083_v17  ;;  %v2085_v30 = vpop.f32.mrb[25].mxu0  ;;  %v6918_v31 = vpop.f32.mrb[29].mxu1  ;;  %v7047_v17 = vld [vmem:[%s7595_s8 + $0x234] ss:$8 sps:$4 sm:$0xff]  }
 0x347   : > { %v6920_v19 = vpack.c.bf16 %v2085_v30, %v2085_v30  ;;  %v2134_v33 = vpop.f32.mrb[30].mxu1  ;;  %v2087_v55 = vpop.f32.mrb[26].mxu0  ;;  %v2138_v30 = vpack.c.bf16 %v6918_v31, %v6918_v31  ;;  %v7065_v31 = vld [vmem:[%s7595_s8 + $0x244] ss:$8 sps:$4 sm:$0xff]  }
 0x348   : > { %v2135_v37 = vpop.f32.mrb[31].mxu1  ;;  %v2088_v50 = vpop.f32.mrb[27].mxu0  ;;  %v7057_v33 = vld [vmem:[%s7595_s8 + $0x230] ss:$8 sps:$4 sm:$0xff]  }
 0x349   : > { %4810 = vmatprep.mubr.msk.bf16.mxu1 %vm2355_vm6, %v6920_v19  ;;  %v2137_v37 = vpack.c.bf16 %v6914_v18, %v6914_v18  ;;  %v5532_v18 = vld [vmem:[%s7599_s12 + $0x18] sm:$0xff]   ;;  %v5537_v50 = vld [vmem:[%s7600_s13 + $0x28] sm:$0xff]  }
 0x34a   : > { %3120 = vmatmul.mubr.bf16.vlgmr.msra.gmra.mrb[36].mxu1 %v6916_v29 }
 0x34b   : > { %3131 = vmatpush1.bf16.msra.mxu1 %v6925_v32 }
 0x34c   : > { %3132 = vmatprep.subr.bf16.mxu1 %v6930_v34 }
 0x34f   : > { %3133 = vmatpush1.bf16.msra.mxu1 %v6939_v35 }
 0x350   : > { %3134 = vmatprep.subr.bf16.mxu1 %v6945_v54 }
 0x353   : > { %3135 = vmatpush1.bf16.msra.mxu1 %v6951_v36 }
 0x354   : > { %3136 = vmatprep.subr.bf16.mxu1 %v6957_v38 }
 0x357   : > { %3137 = vmatpush1.bf16.msra.mxu1 %v6963_v39 }
 0x358   : > { %3138 = vmatprep.subr.bf16.mxu1 %v6969_v40 }
 0x35b   : > { %3139 = vmatpush1.bf16.msra.mxu1 %v6975_v41 }
 0x35c   : > { %3140 = vmatprep.subr.bf16.mxu1 %v6981_v42 }
 0x35f   : > { %3141 = vmatpush1.bf16.msra.mxu1 %v6987_v43 }
 0x360   : > { %3142 = vmatprep.subr.bf16.mxu1 %v6993_v44 }
 0x363   : > { %3143 = vmatpush1.bf16.msra.mxu1 %v6999_v45 }
 0x364   : > { %3144 = vmatprep.subr.bf16.mxu1 %v7005_v46 }
 0x367   : > { %3145 = vmatpush1.bf16.msra.mxu1 %v7014_v47 }
 0x368   : > { %4811 = vmatprep.subr.msk.bf16.mxu1 %vm2358_vm7, %v7017_v48 }
 0x36b   : > { %3147 = vmatpush1.bf16.msra.mxu1 %v7023_v52 }
 0x36c   : > { %3176 = vmatprep.subr.bf16.mxu1 %v7028_v53 }
 0x391   : > { %v2179_v56 = vpop.f32.mrb[28].mxu0  ;;  %v2226_v57 = vpop.f32.mrb[32].mxu1 }
 0x392   : > { %v7032_v58 = vpack.c.bf16 %v2179_v56, %v2179_v56  ;;  %v2181_v59 = vpop.f32.mrb[29].mxu0  ;;  %v2228_v60 = vpop.f32.mrb[33].mxu1  ;;  %v2233_v20 = vpack.c.bf16 %v2226_v57, %v2226_v57 }
 0x393   : > { %v7034_v61 = vpack.c.bf16 %v2181_v59, %v2181_v59  ;;  %v2234_v62 = vpack.c.bf16 %v2228_v60, %v2228_v60  ;;  %v2230_v63 = vpop.f32.mrb[34].mxu1  ;;  %v2183_v2 = vpop.f32.mrb[30].mxu0 }
 0x394   : > { %v2231_v11 = vpop.f32.mrb[35].mxu1  ;;  %v2184_v27 = vpop.f32.mrb[31].mxu0 }
 0x395   : > { %4693 = vmatprep.mubr.msk.bf16.mxu0 %vm2355_vm6, %v2234_v62  ;;  %4812 = vmatprep.mubr.msk.bf16.mxu1 %vm2355_vm6, %v7034_v61  ;;  %v5662_v11 = vmov 0.0  }
 0x396   : > { %2533 = vmatmul.mubr.bf16.vlgmr.msra.gmra.mrb[32].mxu0 %v2233_v20  ;;  %3163 = vmatmul.mubr.bf16.vlgmr.msra.gmra.mrb[36].mxu1 %v7032_v58 }
 0x397   : > { %2653 = vmatpush1.bf16.msra.mxu0 %v6809_v21  ;;  %3177 = vmatpush1.bf16.msra.mxu1 %v7039_v0  ;;  %v7074_v21 = vld [vmem:[%s7595_s8 + $0x240] ss:$8 sps:$4 sm:$0xff]  }
 0x398   : > { %4730 = vmatprep.mubr.msk.bf16.mxu0 %vm2355_vm6, %v6674_v28  ;;  %4814 = vmatprep.mubr.msk.bf16.mxu1 %vm2355_vm6, %v2138_v30  ;;  %v7081_v28 = vld [vmem:[%s7595_s8 + $0x254] ss:$8 sps:$4 sm:$0xff]   ;;  %v4845_v30 = vld [vmem:[%s7601_s14] ss:$0 sm:$0xff] }
 0x399   : > { %2654 = vmatprep.subr.bf16.mxu0 %v6814_v4  ;;  %3178 = vmatprep.subr.bf16.mxu1 %v7047_v17  ;;  %v7088_v4 = vld [vmem:[%s7595_s8 + $0x250] ss:$8 sps:$4 sm:$0xff]  }
 0x39b   : > { %2655 = vmatpush1.bf16.msra.mxu0 %v6821_v22  ;;  %3179 = vmatpush1.bf16.msra.mxu1 %v7057_v33  ;;  %v7095_v22 = vld [vmem:[%s7595_s8 + $0x264] ss:$8 sps:$4 sm:$0xff]  }
 0x39c   : > { %2656 = vmatprep.subr.bf16.mxu0 %v6827_v23  ;;  %3180 = vmatprep.subr.bf16.mxu1 %v7065_v31  ;;  %v7102_v23 = vld [vmem:[%s7595_s8 + $0x260] ss:$8 sps:$4 sm:$0xff]  }
 0x39f   : > { %2657 = vmatpush1.bf16.msra.mxu0 %v6833_v3  ;;  %3181 = vmatpush1.bf16.msra.mxu1 %v7074_v21  ;;  %v5517_v3 = vld [vmem:[%s7595_s8 + $0x274] ss:$8 sps:$4 sm:$0xff]  }
 0x3a0   : > { %2658 = vmatprep.subr.bf16.mxu0 %v6839_v5  ;;  %3182 = vmatprep.subr.bf16.mxu1 %v7081_v28  ;;  %v5515_v5 = vld [vmem:[%s7595_s8 + $0x270] ss:$8 sps:$4 sm:$0xff]  }
 0x3a3   : > { %2659 = vmatpush1.bf16.msra.mxu0 %v6845_v24  ;;  %3183 = vmatpush1.bf16.msra.mxu1 %v7088_v4  ;;  %v5520_v24 = vld [vmem:[%s7595_s8 + $0x284] ss:$8 sps:$4 sm:$0xff]  }
 0x3a4   : > { %2660 = vmatprep.subr.bf16.mxu0 %v6851_v25  ;;  %3184 = vmatprep.subr.bf16.mxu1 %v7095_v22  ;;  %v5518_v25 = vld [vmem:[%s7595_s8 + $0x280] ss:$8 sps:$4 sm:$0xff]  }
 0x3a7   : > { %2661 = vmatpush1.bf16.msra.mxu0 %v6857_v6  ;;  %3185 = vmatpush1.bf16.msra.mxu1 %v7102_v23  ;;  %v5523_v6 = vld [vmem:[%s7595_s8 + $0x294] ss:$8 sps:$4 sm:$0xff]  }
 0x3a8   : > { %2662 = vmatprep.subr.bf16.mxu0 %v6863_v26  ;;  %3186 = vmatprep.subr.bf16.mxu1 %v5517_v3  ;;  %v4784_v26 = vld [vmem:[%s7595_s8 + $0x2a0] sm:$0x11] }
 0x3a9   : > { %v4801_v55 = vcombine.low %v4784_v26, %v4784_v26 }
 0x3ab   : > { %2663 = vmatpush1.bf16.msra.mxu0 %v6869_v7  ;;  %3187 = vmatpush1.bf16.msra.mxu1 %v5515_v5  ;;  %v5521_v7 = vld [vmem:[%s7595_s8 + $0x290] ss:$8 sps:$4 sm:$0xff]  }
 0x3ac   : > { %2664 = vmatprep.subr.bf16.mxu0 %v6875_v8  ;;  %3188 = vmatprep.subr.bf16.mxu1 %v5520_v24  ;;  %v4802_v8 = vcombine.high %v4784_v26, %v4784_v26  ;;  %v3547_v26 = vld [vmem:[%s7602_s15] sm:$0x1] }
 0x3af   : > { %2665 = vmatpush1.bf16.msra.mxu0 %v6881_v9  ;;  %3189 = vmatpush1.bf16.msra.mxu1 %v5518_v25  ;;  %v2957_v9 = vsel %vm2358_vm7, %v4801_v55, 0  ;;  %v5555_v55 = vld [vmem:[%s7603_s16 + $0x3c] sm:$0xff]  }
 0x3b0   : > { %2666 = vmatprep.subr.bf16.mxu0 %v6887_v10  ;;  %3190 = vmatprep.subr.bf16.mxu1 %v5523_v6  ;;  %v5527_v10 = vld [vmem:[%s7600_s13] sm:$0xff]  }
 0x3b3   : > { %2667 = vmatpush1.bf16.msra.mxu0 %v6896_v12  ;;  %3191 = vmatpush1.bf16.msra.mxu1 %v5521_v7  ;;  %v5528_v12 = vld [vmem:[%s7599_s12 + $0x8] sm:$0xff]  }
 0x3b4   : > { %4729 = vmatprep.subr.msk.bf16.mxu0 %vm2358_vm7, %v6899_v13  ;;  %4813 = vmatprep.subr.msk.bf16.mxu1 %vm2358_vm7, %v4802_v8  ;;  %v5529_v13 = vld [vmem:[%s7600_s13 + $0x8] sm:$0xff]  }
 0x3b7   : > { %2669 = vmatpush1.bf16.msra.mxu0 %v6905_v15  ;;  %3193 = vmatpush1.bf16.msra.mxu1 %v2957_v9  ;;  %v5530_v15 = vld [vmem:[%s7599_s12 + $0x10] sm:$0xff]  }
 0x3b8   : > { %2807 = vmatprep.subr.bf16.mxu0 %v6910_v16  ;;  %3496 = vmatprep.subr.bf16.mxu1 %v5661_v1  ;;  %v5531_v16 = vld [vmem:[%s7600_s13 + $0x10] sm:$0xff]  }
 0x3ba   : > { %2685 = vmatmul.mubr.bf16.vlgmr.msra.gmra.mrb[32].mxu0 %v6672_v14  ;;  %3209 = vmatmul.mubr.bf16.vlgmr.msra.gmra.mrb[36].mxu1 %v2137_v37  ;;  %v5526_v14 = vld [vmem:[%s7599_s12] sm:$0xff]  }
 0x3bb   : > { %2808 = vmatpush1.bf16.msra.mxu0 %v6925_v32  ;;  %4767 = vmatprep.mubr.msk.bf16.mxu0 %vm2355_vm6, %v6920_v19  ;;  %v5534_v19 = vld [vmem:[%s7599_s12 + $0x20] sm:$0xff]  }
 0x3bc   : > { %2809 = vmatprep.subr.bf16.mxu0 %v6930_v34  ;;  %3497 = vmatpush1.bf16.msra.mxu1 %v5527_v10  ;;  %v5535_v32 = vld [vmem:[%s7600_s13 + $0x20] sm:$0xff]   ;;  %v5536_v34 = vld [vmem:[%s7599_s12 + $0x28] sm:$0xff]  }
 0x3bd   : > { %3498 = vmatprep.subr.bf16.mxu1 %v5661_v1  ;;  %v5557_v37 = vld [vmem:[%s7603_s16 + $0x44] sm:$0xff]   ;;  %v5559_v10 = vld [vmem:[%s7603_s16 + $0x4c] sm:$0xff]  }
 0x3bf   : > { %2810 = vmatpush1.bf16.msra.mxu0 %v6939_v35  ;;  %v5538_v35 = vld [vmem:[%s7599_s12 + $0x30] sm:$0xff]  }
 0x3c0   : > { %2811 = vmatprep.subr.bf16.mxu0 %v6945_v54  ;;  %3499 = vmatpush1.bf16.msra.mxu1 %v5529_v13  ;;  %v5539_v54 = vld [vmem:[%s7600_s13 + $0x30] sm:$0xff]  }
 0x3c1   : > { %3500 = vmatprep.subr.bf16.mxu1 %v5661_v1  ;;  %v5561_v13 = vld [vmem:[%s7603_s16 + $0x54] sm:$0xff]  }
 0x3c3   : > { %2812 = vmatpush1.bf16.msra.mxu0 %v6951_v36  ;;  %v5540_v36 = vld [vmem:[%s7599_s12 + $0x38] sm:$0xff]  }
 0x3c4   : > { %2813 = vmatprep.subr.bf16.mxu0 %v6957_v38  ;;  %3501 = vmatpush1.bf16.msra.mxu1 %v5531_v16  ;;  %v5541_v38 = vld [vmem:[%s7600_s13 + $0x38] sm:$0xff]  }
 0x3c5   : > { %3502 = vmatprep.subr.bf16.mxu1 %v5661_v1  ;;  %v5563_v16 = vld [vmem:[%s7603_s16 + $0x5c] sm:$0xff]  }
 0x3c7   : > { %2814 = vmatpush1.bf16.msra.mxu0 %v6963_v39  ;;  %v5542_v39 = vld [vmem:[%s7599_s12 + $0x40] sm:$0xff]  }
 0x3c8   : > { %2815 = vmatprep.subr.bf16.mxu0 %v6969_v40  ;;  %v5543_v40 = vld [vmem:[%s7600_s13 + $0x40] sm:$0xff]  }
 0x3cb   : > { %2816 = vmatpush1.bf16.msra.mxu0 %v6975_v41  ;;  %v5544_v41 = vld [vmem:[%s7599_s12 + $0x48] sm:$0xff]  }
 0x3cc   : > { %2817 = vmatprep.subr.bf16.mxu0 %v6981_v42  ;;  %v5545_v42 = vld [vmem:[%s7600_s13 + $0x48] sm:$0xff]  }
 0x3cf   : > { %2818 = vmatpush1.bf16.msra.mxu0 %v6987_v43  ;;  %v5546_v43 = vld [vmem:[%s7599_s12 + $0x50] sm:$0xff]  }
 0x3d0   : > { %2819 = vmatprep.subr.bf16.mxu0 %v6993_v44  ;;  %v5547_v44 = vld [vmem:[%s7600_s13 + $0x50] sm:$0xff]  }
 0x3d3   : > { %2820 = vmatpush1.bf16.msra.mxu0 %v6999_v45  ;;  %v5548_v45 = vld [vmem:[%s7599_s12 + $0x58] sm:$0xff]  }
 0x3d4   : > { %2821 = vmatprep.subr.bf16.mxu0 %v7005_v46  ;;  %v5549_v46 = vld [vmem:[%s7600_s13 + $0x58] sm:$0xff]  }
 0x3d7   : > { %2822 = vmatpush1.bf16.msra.mxu0 %v7014_v47  ;;  %v5551_v47 = vld [vmem:[%s7600_s13 + $0x60] sm:$0xff]  }
 0x3d8   : > { %4766 = vmatprep.subr.msk.bf16.mxu0 %vm2358_vm7, %v7017_v48  ;;  %v5552_v48 = vld [vmem:[%s7599_s12 + $0x68] sm:$0x3f]  }
 0x3db   : > { %2824 = vmatpush1.bf16.msra.mxu0 %v7023_v52  ;;  %v3340_v52 = vsel %vm3338_vm8, %v5552_v48, 0  ;;  %v4901_v48 = vld [vmem:[%s7602_s15 + $0x3] sm:$0x1] }
 0x3dc   : > { %2962 = vmatprep.subr.bf16.mxu0 %v7028_v53  ;;  %v3494_v53 = vsel %vm3338_vm8, %v5553_v51, 0  ;;  %v5571_v51 = vld [vmem:[%s7603_s16 + $0x9c] sm:$0xff]  }
 0x3de   : > { %2840 = vmatmul.mubr.bf16.vlgmr.msra.gmra.mrb[32].mxu0 %v6916_v29  ;;  %v5533_v29 = vld [vmem:[%s7600_s13 + $0x18] sm:$0xff]  }
 0x3df   : > { %2963 = vmatpush1.bf16.msra.mxu0 %v7039_v0  ;;  %4804 = vmatprep.mubr.msk.bf16.mxu0 %vm2355_vm6, %v7034_v61 }
 0x3e0   : > { %2964 = vmatprep.subr.bf16.mxu0 %v7047_v17  ;;  %3503 = vmatpush1.bf16.msra.mxu1 %v5533_v29 }
 0x3e1   : > { %3504 = vmatprep.subr.bf16.mxu1 %v5661_v1 }
 0x3e3   : > { %2965 = vmatpush1.bf16.msra.mxu0 %v7057_v33 }
 0x3e4   : > { %2966 = vmatprep.subr.bf16.mxu0 %v7065_v31  ;;  %3505 = vmatpush1.bf16.msra.mxu1 %v5535_v32  ;;  %v5567_v32 = vld [vmem:[%s7603_s16 + $0x30] ss:$0 sps:$4 sm:$0x33]  }
 0x3e5   : > { %3506 = vmatprep.subr.bf16.mxu1 %v5661_v1 }
 0x3e7   : > { %2967 = vmatpush1.bf16.msra.mxu0 %v7074_v21 }
 0x3e8   : > { %2968 = vmatprep.subr.bf16.mxu0 %v7081_v28  ;;  %3507 = vmatpush1.bf16.msra.mxu1 %v5537_v50 }
 0x3e9   : > { %3508 = vmatprep.subr.bf16.mxu1 %v5661_v1 }
 0x3eb   : > { %2969 = vmatpush1.bf16.msra.mxu0 %v7088_v4 }
 0x3ec   : > { %2970 = vmatprep.subr.bf16.mxu0 %v7095_v22  ;;  %3509 = vmatpush1.bf16.msra.mxu1 %v5539_v54 }
 0x3ed   : > { %3510 = vmatprep.subr.bf16.mxu1 %v5661_v1 }
 0x3ef   : > { %2971 = vmatpush1.bf16.msra.mxu0 %v7102_v23 }
 0x3f0   : > { %2972 = vmatprep.subr.bf16.mxu0 %v5517_v3  ;;  %3511 = vmatpush1.bf16.msra.mxu1 %v5541_v38 }
 0x3f1   : > { %3512 = vmatprep.subr.bf16.mxu1 %v5661_v1 }
 0x3f3   : > { %2973 = vmatpush1.bf16.msra.mxu0 %v5515_v5 }
 0x3f4   : > { %2974 = vmatprep.subr.bf16.mxu0 %v5520_v24  ;;  %3513 = vmatpush1.bf16.msra.mxu1 %v5543_v40  ;;  %v5568_v40 = vld [vmem:[%s7603_s16 + $0x68] sm:$0xff]  }
 0x3f5   : > { %3514 = vmatprep.subr.bf16.mxu1 %v5661_v1 }
 0x3f7   : > { %2975 = vmatpush1.bf16.msra.mxu0 %v5518_v25 }
 0x3f8   : > { %2976 = vmatprep.subr.bf16.mxu0 %v5523_v6  ;;  %3515 = vmatpush1.bf16.msra.mxu1 %v5545_v42  ;;  %v4847_v6 = vld [vmem:[%s7602_s15 + $0x1] sm:$0x1] }
 0x3f9   : > { %3516 = vmatprep.subr.bf16.mxu1 %v5661_v1 }
 0x3fb   : > { %2977 = vmatpush1.bf16.msra.mxu0 %v5521_v7  ;;  %v5554_v7 = vld [vmem:[%s7603_s16 + $0x34] sm:$0xff]  }
 0x3fc   : > { %4803 = vmatprep.subr.msk.bf16.mxu0 %vm2358_vm7, %v4802_v8  ;;  %3517 = vmatpush1.bf16.msra.mxu1 %v5547_v44  ;;  %v5556_v8 = vld [vmem:[%s7603_s16] sm:$0xff]  }
 0x3fd   : > { %3518 = vmatprep.subr.bf16.mxu1 %v5661_v1 }
 0x3ff   : > { %2979 = vmatpush1.bf16.msra.mxu0 %v2957_v9  ;;  %v5558_v9 = vld [vmem:[%s7603_s16 + $0x8] sm:$0xff]  }
 0x400   : > { %3342 = vmatprep.subr.bf16.mxu0 %v5661_v1  ;;  %3519 = vmatpush1.bf16.msra.mxu1 %v5549_v46  ;;  %v4878_v46 = vld [vmem:[%s7602_s15 + $0x2] sm:$0x1] }
 0x401   : > { %3520 = vmatprep.subr.bf16.mxu1 %v5661_v1 }
 0x402   : > { %2995 = vmatmul.mubr.bf16.vlgmr.msra.gmra.mrb[32].mxu0 %v7032_v58 }
 0x403   : > { %3343 = vmatpush1.bf16.msra.mxu0 %v5526_v14  ;;  %v5560_v14 = vld [vmem:[%s7603_s16 + $0x10] sm:$0xff]  }
 0x404   : > { %3344 = vmatprep.subr.bf16.mxu0 %v5661_v1  ;;  %3521 = vmatpush1.bf16.msra.mxu1 %v5551_v47  ;;  %v5572_v47 = vld [vmem:[%s7603_s16 + $0x80] sm:$0xff]  }
 0x405   : > { %3522 = vmatprep.subr.bf16.mxu1 %v5661_v1 }
 0x407   : > { %3345 = vmatpush1.bf16.msra.mxu0 %v5528_v12  ;;  %v5562_v12 = vld [vmem:[%s7603_s16 + $0x18] sm:$0xff]  }
 0x408   : > { %3346 = vmatprep.subr.bf16.mxu0 %v5661_v1  ;;  %3523 = vmatpush1.bf16.msra.mxu1 %v3494_v53  ;;  %v5573_v53 = vld [vmem:[%s7603_s16 + $0xa4] sm:$0xff]  }
 0x409   : > { %5027 = vmatprep.subr.bf16.mxu1 %v5662_v11 }
 0x40b   : > { %3347 = vmatpush1.bf16.msra.mxu0 %v5530_v15  ;;  %v5564_v15 = vld [vmem:[%s7603_s16 + $0x20] sm:$0xff]  }
 0x40c   : > { %3348 = vmatprep.subr.bf16.mxu0 %v5661_v1 }
 0x40f   : > { %3349 = vmatpush1.bf16.msra.mxu0 %v5532_v18  ;;  %v5565_v18 = vld [vmem:[%s7603_s16 + $0x64] ss:$0 sps:$4 sm:$0x33]  }
 0x410   : > { %3350 = vmatprep.subr.bf16.mxu0 %v5661_v1  ;;  %v3712_v29 = vsel %vm1501_vm2, %v5565_v18, 0  ;;  %v5591_v18 = vld [vmem:[%s7605_s18 + $0x10] sm:$0xff]  }
 0x413   : > { %3351 = vmatpush1.bf16.msra.mxu0 %v5534_v19  ;;  %v5566_v19 = vld [vmem:[%s7603_s16 + $0x28] sm:$0xff]  }
 0x414   : > { %3352 = vmatprep.subr.bf16.mxu0 %v5661_v1 }
 0x417   : > { %3353 = vmatpush1.bf16.msra.mxu0 %v5536_v34  ;;  %v3797_v34 = vsel %vm1501_vm2, %v5567_v32, 0  ;;  %v5594_v32 = vld [vmem:[%s7605_s18 + $0x28] sm:$0xff]  }
 0x418   : > { %3354 = vmatprep.subr.bf16.mxu0 %v5661_v1 }
 0x41b   : > { %3355 = vmatpush1.bf16.msra.mxu0 %v5538_v35 }
 0x41c   : > { %3356 = vmatprep.subr.bf16.mxu0 %v5661_v1 }
 0x41f   : > { %3357 = vmatpush1.bf16.msra.mxu0 %v5540_v36 }
 0x420   : > { %3358 = vmatprep.subr.bf16.mxu0 %v5661_v1 }
 0x423   : > { %3359 = vmatpush1.bf16.msra.mxu0 %v5542_v39 }
 0x424   : > { %3360 = vmatprep.subr.bf16.mxu0 %v5661_v1 }
 0x427   : > { %3361 = vmatpush1.bf16.msra.mxu0 %v5544_v41 }
 0x428   : > { %3362 = vmatprep.subr.bf16.mxu0 %v5661_v1 }
 0x42b   : > { %3363 = vmatpush1.bf16.msra.mxu0 %v5546_v43 }
 0x42c   : > { %3364 = vmatprep.subr.bf16.mxu0 %v5661_v1 }
 0x42f   : > { %3365 = vmatpush1.bf16.msra.mxu0 %v5548_v45  ;;  %v5569_v45 = vld [vmem:[%s7603_s16 + $0x70] sm:$0xff]  }
 0x430   : > { %3366 = vmatprep.subr.bf16.mxu0 %v5661_v1 }
 0x433   : > { %3367 = vmatpush1.bf16.msra.mxu0 %v5550_v49  ;;  %v5570_v49 = vld [vmem:[%s7603_s16 + $0x78] sm:$0xff]  }
 0x434   : > { %3368 = vmatprep.subr.bf16.mxu0 %v5661_v1 }
 0x437   : > { %3369 = vmatpush1.bf16.msra.mxu0 %v3340_v52  ;;  %v5574_v52 = vld [vmem:[%s7603_s16 + $0x88] sm:$0xff]  }
 0x438   : > { %5021 = vmatprep.subr.bf16.mxu0 %v5662_v11 }
 0x48d   : > { %v3210_v56 = vpop.f32.mrb[36].mxu1 }
 0x48e   : > { %v3212_v57 = vpop.f32.mrb[37].mxu1 }
 0x48f   : > { %v3214_v58 = vpop.f32.mrb[38].mxu1 }
 0x490   : > { %v3215_v59 = vpop.f32.mrb[39].mxu1  ;;  %v5577_v58 = vld [vmem:[%s7603_s16 + $0xb4] sm:$0xff]  }
 0x491   : > { %v5578_v59 = vld [vmem:[%s7603_s16 + $0x98] ss:$0 sps:$4 sm:$0x33]  }
 0x4d5   : > { %v2996_v60 = vpop.f32.mrb[32].mxu0 }
 0x4d6   : > { %v3219_v61 = vmax.f32 %v2996_v60, %v3210_v56  ;;  %v2998_v1 = vpop.f32.mrb[33].mxu0  ;;  %v5575_v56 = vld [vmem:[%s7603_s16 + $0xac] sm:$0xff]   ;;  %v3942_v60 = vsel %vm1501_vm2, %v5578_v59, 0 }
 0x4d7   : > { %v3220_v62 = vmax.f32 %v2998_v1, %v3212_v57  ;;  %v3000_v63 = vpop.f32.mrb[34].mxu0  ;;  %v5576_v57 = vld [vmem:[%s7603_s16 + $0x90] sm:$0xff]   ;;  %v5580_v1 = vld [vmem:[%s7603_s16 + $0xc4] sm:$0xff]  }
 0x4d8   : > { %v3001_v0 = vpop.f32.mrb[35].mxu0  ;;  %v3221_v20 = vpack.c.bf16 %v3219_v61, %v3219_v61  ;;  %v5579_v61 = vld [vmem:[%s7603_s16 + $0xbc] sm:$0xff]  }
 0x4d9   : > { %v3222_v2 = vpack.c.bf16 %v3220_v62, %v3220_v62  ;;  %v5581_v62 = vld [vmem:[%s7603_s16 + $0xcc] ss:$0 sps:$4 sm:$0x33]  }
 0x4da   : > { %v4088_v63 = vsel %vm1501_vm2, %v5581_v62, 0 }
 0x4db   : > { %4829 = vmatprep.mubr.msk.bf16.mxu0 %vm3334_vm9, %v3222_v2  ;;  %4844 = vmatprep.mubr.msk.bf16.mxu1 %vm3334_vm9, %v3222_v2 }
 0x4dc   : > { %3375 = vmatmul.mubr.bf16.vlgmr.msra.gmra.mrb[36].mxu0 %v3221_v20  ;;  %3529 = vmatmul.mubr.bf16.vlgmr.msra.gmra.mrb[40].mxu1 %v3221_v20 }
 0x4dd   : > { %5029 = vmatprep.mubr.msk.bf16.mxu1 %vm5663_vm10, %v5662_v11  ;;  %5023 = vmatprep.mubr.msk.bf16.mxu0 %vm5663_vm10, %v5662_v11 }
 0x5af   : > { %v3376_v27 = vpop.f32.mrb[36].mxu0  ;;  %v3530_v17 = vpop.f32.mrb[40].mxu1 }
 0x5b0   : > { %v3536_v33 = vmax.f32 %v3376_v27, %v3530_v17  ;;  %v3378_v31 = vpop.f32.mrb[37].mxu0  ;;  %v3532_v21 = vpop.f32.mrb[41].mxu1 }
 0x5b1   : > { %v3379_v28 = vpop.f32.mrb[38].mxu0  ;;  %v3533_v4 = vpop.f32.mrb[42].mxu1 }
 0x5b2   : > { %v3544_v22 = vadd.f32 %v4845_v30, %v3536_v33  ;;  %v3380_v23 = vpop.f32.mrb[39].mxu0  ;;  %v3534_v3 = vpop.f32.mrb[43].mxu1 }
 0x5b4   : > { %v3545_v5 = vmax.f32 %v3544_v22, 0.0 }
 0x5b6   : > { %v3546_v24 = vpack.c.bf16 %v3545_v5, %v3545_v5 }
 0x5b8   : > { %v7301_v25 = vsel %vm2042_vm4, %v3546_v24, 0  ;;  %v4924_v24 = vld [vmem:[%s7602_s15 + $0x4] sm:$0x1] }
 0x5b9   : > { %5022 = vmatpush3.bf16.msra.mxu0 %v7301_v25  ;;  %5028 = vmatpush3.bf16.msra.mxu1 %v7301_v25 }
 0x5ba   : > { %5033 = vmatprep.subr.bf16.mxu0 %v5662_v11  ;;  %5051 = vmatprep.subr.bf16.mxu1 %v5662_v11 }
 0x5bc   : > { %5030 = vmatmul.mubr.msk.bf16.vlgmr.msra.gmra.mrb[44].mxu1 %vm2038_vm5, %v4847_v6  ;;  %5024 = vmatmul.mubr.msk.bf16.vlgmr.msra.gmra.mrb[40].mxu0 %vm2038_vm5, %v3547_v26  ;;  %v5582_v6 = vld [vmem:[%s7603_s16 + $0xd0] sm:$0xff]  }
 0x5bd   : > { %5034 = vmatpush3.bf16.msra.mxu0 %v5554_v7  ;;  %5052 = vmatpush3.bf16.msra.mxu1 %v5556_v8 }
 0x5be   : > { %5035 = vmatprep.subr.bf16.mxu0 %v5662_v11  ;;  %5053 = vmatprep.subr.bf16.mxu1 %v5662_v11 }
 0x5bf   : > { %5047 = vmatprep.mubr.msk.bf16.mxu0 %vm5663_vm10, %v5662_v11  ;;  %5065 = vmatprep.mubr.msk.bf16.mxu1 %vm5663_vm10, %v5662_v11 }
 0x5c1   : > { %5036 = vmatpush3.bf16.msra.mxu0 %v5555_v55  ;;  %5054 = vmatpush3.bf16.msra.mxu1 %v5558_v9  ;;  %v5583_v55 = vld [vmem:[%s7603_s16 + $0xd8] sm:$0xff]   ;;  %v5584_v9 = vld [vmem:[%s7603_s16 + $0xe0] sm:$0xff]  }
 0x5c2   : > { %5037 = vmatprep.subr.bf16.mxu0 %v5662_v11  ;;  %5055 = vmatprep.subr.bf16.mxu1 %v5662_v11 }
 0x5c5   : > { %5038 = vmatpush3.bf16.msra.mxu0 %v5557_v37  ;;  %5056 = vmatpush3.bf16.msra.mxu1 %v5560_v14  ;;  %v5585_v37 = vld [vmem:[%s7603_s16 + $0xe8] sm:$0xff]   ;;  %v5586_v14 = vld [vmem:[%s7603_s16 + $0xf0] sm:$0xff]  }
 0x5c6   : > { %5039 = vmatprep.subr.bf16.mxu0 %v5662_v11  ;;  %5057 = vmatprep.subr.bf16.mxu1 %v5662_v11 }
 0x5c9   : > { %5040 = vmatpush3.bf16.msra.mxu0 %v5559_v10  ;;  %5058 = vmatpush3.bf16.msra.mxu1 %v5562_v12  ;;  %v5587_v10 = vld [vmem:[%s7603_s16 + $0xf8] sm:$0xff]   ;;  %v5588_v12 = vld [vmem:[%s7603_s16 + $0x100] ss:$0 sps:$4 sm:$0x33]  }
 0x5ca   : > { %5041 = vmatprep.subr.bf16.mxu0 %v5662_v11  ;;  %5059 = vmatprep.subr.bf16.mxu1 %v5662_v11 }
 0x5cd   : > { %5042 = vmatpush3.bf16.msra.mxu0 %v5561_v13  ;;  %5060 = vmatpush3.bf16.msra.mxu1 %v5564_v15  ;;  %v4234_v13 = vsel %vm1501_vm2, %v5588_v12, 0  ;;  %v5589_v15 = vld [vmem:[%s7605_s18] sm:$0xff]  }
 0x5ce   : > { %5043 = vmatprep.subr.bf16.mxu0 %v5662_v11  ;;  %5061 = vmatprep.subr.bf16.mxu1 %v5662_v11 }
 0x5d1   : > { %5044 = vmatpush3.bf16.msra.mxu0 %v5563_v16  ;;  %5062 = vmatpush3.bf16.msra.mxu1 %v5566_v19  ;;  %v5590_v16 = vld [vmem:[%s7605_s18 + $0x8] sm:$0xff]   ;;  %v5593_v19 = vld [vmem:[%s7605_s18 + $0x20] sm:$0xff]  }
 0x5d2   : > { %5045 = vmatprep.subr.bf16.mxu0 %v5662_v11  ;;  %5063 = vmatprep.subr.bf16.mxu1 %v5662_v11 }
 0x5d5   : > { %5046 = vmatpush3.bf16.msra.mxu0 %v3712_v29  ;;  %5064 = vmatpush3.bf16.msra.mxu1 %v3797_v34  ;;  %v5592_v29 = vld [vmem:[%s7605_s18 + $0x18] sm:$0xff]  }
 0x5d6   : > { %5069 = vmatprep.subr.bf16.mxu0 %v5662_v11  ;;  %5075 = vmatprep.subr.bf16.mxu1 %v5662_v11 }
 0x68f   : > { %v3647_v50 = vpop.f32.mrb[44].mxu1  ;;  %v3588_v35 = vpop.f32.mrb[40].mxu0 }
 0x690   : > { %v3653_v54 = vpack.c.bf16 %v3647_v50, %v3647_v50  ;;  %v5031_v36 = vpop.f32.mrb[45].mxu1  ;;  %v3594_v38 = vpack.c.bf16 %v3588_v35, %v3588_v35  ;;  %v5025_v39 = vpop.f32.mrb[41].mxu0 }
 0x691   : > { %v3650_v41 = vpop.f32.mrb[46].mxu1  ;;  %v3591_v42 = vpop.f32.mrb[42].mxu0 }
 0x692   : > { %5048 = vmatmul.mubr.msk.bf16.vlgmr.msra.gmra.mrb[44].mxu0 %vm3707_vm11, %v3653_v54  ;;  %v5032_v43 = vpop.f32.mrb[47].mxu1  ;;  %5066 = vmatmul.mubr.msk.bf16.vlgmr.msra.gmra.mrb[48].mxu1 %vm3707_vm11, %v3594_v38  ;;  %v5026_v44 = vpop.f32.mrb[43].mxu0 }
 0x693   : > { %5070 = vmatpush3.bf16.msra.mxu0 %v7301_v25  ;;  %5071 = vmatprep.mubr.msk.bf16.mxu0 %vm5663_vm10, %v5662_v11 }
 0x694   : > { %5093 = vmatprep.subr.bf16.mxu0 %v5662_v11  ;;  %5076 = vmatpush3.bf16.msra.mxu1 %v5568_v40 }
 0x695   : > { %5077 = vmatprep.subr.bf16.mxu1 %v5662_v11  ;;  %5089 = vmatprep.mubr.msk.bf16.mxu1 %vm5663_vm10, %v5662_v11 }
 0x698   : > { %5078 = vmatpush3.bf16.msra.mxu1 %v5569_v45 }
 0x699   : > { %5079 = vmatprep.subr.bf16.mxu1 %v5662_v11 }
 0x69a   : > { %5072 = vmatmul.mubr.msk.bf16.vlgmr.msra.gmra.mrb[48].mxu0 %vm2038_vm5, %v4878_v46 }
 0x69b   : > { %5094 = vmatpush3.bf16.msra.mxu0 %v7301_v25  ;;  %5095 = vmatprep.mubr.msk.bf16.mxu0 %vm5663_vm10, %v5662_v11 }
 0x69c   : > { %5080 = vmatpush3.bf16.msra.mxu1 %v5570_v49  ;;  %5099 = vmatprep.subr.bf16.mxu0 %v5662_v11 }
 0x69d   : > { %5081 = vmatprep.subr.bf16.mxu1 %v5662_v11 }
 0x6a0   : > { %5082 = vmatpush3.bf16.msra.mxu1 %v5572_v47  ;;  %v5595_v47 = vld [vmem:[%s7605_s18 + $0x30] sm:$0xff]  }
 0x6a1   : > { %5083 = vmatprep.subr.bf16.mxu1 %v5662_v11 }
 0x6a2   : > { %5096 = vmatmul.mubr.msk.bf16.vlgmr.msra.gmra.mrb[52].mxu0 %vm2038_vm5, %v4901_v48  ;;  %v5596_v48 = vld [vmem:[%s7605_s18 + $0x38] sm:$0xff]  }
 0x6a3   : > { %5100 = vmatpush3.bf16.msra.mxu0 %v5571_v51  ;;  %5113 = vmatprep.mubr.msk.bf16.mxu0 %vm5663_vm10, %v5662_v11 }
 0x6a4   : > { %5101 = vmatprep.subr.bf16.mxu0 %v5662_v11  ;;  %5084 = vmatpush3.bf16.msra.mxu1 %v5574_v52  ;;  %v4277_v52 = vld [vmem:[%s7604_s17] sm:$0x1] }
 0x6a5   : > { %5085 = vmatprep.subr.bf16.mxu1 %v5662_v11 }
 0x6a7   : > { %5102 = vmatpush3.bf16.msra.mxu0 %v5573_v53 }
 0x6a8   : > { %5103 = vmatprep.subr.bf16.mxu0 %v5662_v11  ;;  %5086 = vmatpush3.bf16.msra.mxu1 %v5576_v57 }
 0x6a9   : > { %5087 = vmatprep.subr.bf16.mxu1 %v5662_v11 }
 0x6ab   : > { %5104 = vmatpush3.bf16.msra.mxu0 %v5575_v56 }
 0x6ac   : > { %5105 = vmatprep.subr.bf16.mxu0 %v5662_v11  ;;  %5088 = vmatpush3.bf16.msra.mxu1 %v3942_v60 }
 0x6ad   : > { %5117 = vmatprep.subr.bf16.mxu1 %v5662_v11 }
 0x6af   : > { %5106 = vmatpush3.bf16.msra.mxu0 %v5577_v58 }
 0x6b0   : > { %5107 = vmatprep.subr.bf16.mxu0 %v5662_v11 }
 0x6b3   : > { %5108 = vmatpush3.bf16.msra.mxu0 %v5579_v61 }
 0x6b4   : > { %5109 = vmatprep.subr.bf16.mxu0 %v5662_v11 }
 0x6b7   : > { %5110 = vmatpush3.bf16.msra.mxu0 %v5580_v1 }
 0x6b8   : > { %5111 = vmatprep.subr.bf16.mxu0 %v5662_v11 }
 0x6bb   : > { %5112 = vmatpush3.bf16.msra.mxu0 %v4088_v63 }
 0x6bc   : > { %5141 = vmatprep.subr.bf16.mxu0 %v5662_v11 }
 0x765   : > { %v3748_v0 = vpop.f32.mrb[44].mxu0  ;;  %v3833_v2 = vpop.f32.mrb[48].mxu1 }
 0x766   : > { %v5049_v20 = vpop.f32.mrb[45].mxu0  ;;  %v7457_v27 = vadd.f32 %v3833_v2, %v3748_v0  ;;  %v5067_v17 = vpop.f32.mrb[49].mxu1 }
 0x767   : > { %v3751_v30 = vpop.f32.mrb[46].mxu0  ;;  %v3836_v33 = vpop.f32.mrb[50].mxu1 }
 0x768   : > { %v5050_v31 = vpop.f32.mrb[47].mxu0  ;;  %v5068_v21 = vpop.f32.mrb[51].mxu1 }
 0x76d   : > { %v3878_v28 = vpop.f32.mrb[48].mxu0 }
 0x76e   : > { %v3884_v4 = vpack.c.bf16 %v3878_v28, %v3878_v28  ;;  %v5073_v22 = vpop.f32.mrb[49].mxu0 }
 0x76f   : > { %v3881_v23 = vpop.f32.mrb[50].mxu0 }
 0x770   : > { %5090 = vmatmul.mubr.msk.bf16.vlgmr.msra.gmra.mrb[52].mxu1 %vm3707_vm11, %v3884_v4  ;;  %v5074_v3 = vpop.f32.mrb[51].mxu0 }
 0x771   : > { %5118 = vmatpush3.bf16.msra.mxu1 %v7301_v25  ;;  %5119 = vmatprep.mubr.msk.bf16.mxu1 %vm5663_vm10, %v5662_v11 }
 0x772   : > { %5123 = vmatprep.subr.bf16.mxu1 %v5662_v11 }
 0x775   : > { %v4024_v5 = vpop.f32.mrb[52].mxu0 }
 0x776   : > { %v4030_v26 = vpack.c.bf16 %v4024_v5, %v4024_v5  ;;  %v5097_v7 = vpop.f32.mrb[53].mxu0 }
 0x777   : > { %v4027_v8 = vpop.f32.mrb[54].mxu0 }
 0x778   : > { %5114 = vmatmul.mubr.msk.bf16.vlgmr.msra.gmra.mrb[56].mxu0 %vm3707_vm11, %v4030_v26  ;;  %5120 = vmatmul.mubr.msk.bf16.vlgmr.msra.gmra.mrb[56].mxu1 %vm2038_vm5, %v4924_v24  ;;  %v5098_v25 = vpop.f32.mrb[55].mxu0 }
 0x779   : > { %5124 = vmatpush3.bf16.msra.mxu1 %v5582_v6  ;;  %5137 = vmatprep.mubr.msk.bf16.mxu1 %vm5663_vm10, %v5662_v11 }
 0x77a   : > { %5125 = vmatprep.subr.bf16.mxu1 %v5662_v11  ;;  %5157 = vmatprep.mubr.msk.bf16.mxu0 %vm5663_vm10, %v5662_v11 }
 0x77b   : > { %5142 = vmatpush3.bf16.msra.mxu0 %v5589_v15 }
 0x77c   : > { %5143 = vmatprep.subr.bf16.mxu0 %v5662_v11 }
 0x77d   : > { %5126 = vmatpush3.bf16.msra.mxu1 %v5583_v55 }
 0x77e   : > { %5127 = vmatprep.subr.bf16.mxu1 %v5662_v11 }
 0x77f   : > { %5144 = vmatpush3.bf16.msra.mxu0 %v5590_v16 }
 0x780   : > { %5145 = vmatprep.subr.bf16.mxu0 %v5662_v11 }
 0x781   : > { %5128 = vmatpush3.bf16.msra.mxu1 %v5584_v9 }
 0x782   : > { %5129 = vmatprep.subr.bf16.mxu1 %v5662_v11 }
 0x783   : > { %5146 = vmatpush3.bf16.msra.mxu0 %v5591_v18 }
 0x784   : > { %5147 = vmatprep.subr.bf16.mxu0 %v5662_v11 }
 0x785   : > { %5130 = vmatpush3.bf16.msra.mxu1 %v5585_v37 }
 0x786   : > { %5131 = vmatprep.subr.bf16.mxu1 %v5662_v11 }
 0x787   : > { %5148 = vmatpush3.bf16.msra.mxu0 %v5592_v29 }
 0x788   : > { %5149 = vmatprep.subr.bf16.mxu0 %v5662_v11 }
 0x789   : > { %5132 = vmatpush3.bf16.msra.mxu1 %v5586_v14 }
 0x78a   : > { %5133 = vmatprep.subr.bf16.mxu1 %v5662_v11 }
 0x78b   : > { %5150 = vmatpush3.bf16.msra.mxu0 %v5593_v19 }
 0x78c   : > { %5151 = vmatprep.subr.bf16.mxu0 %v5662_v11 }
 0x78d   : > { %5134 = vmatpush3.bf16.msra.mxu1 %v5587_v10 }
 0x78e   : > { %5135 = vmatprep.subr.bf16.mxu1 %v5662_v11 }
 0x78f   : > { %5152 = vmatpush3.bf16.msra.mxu0 %v5594_v32 }
 0x790   : > { %5153 = vmatprep.subr.bf16.mxu0 %v5662_v11 }
 0x791   : > { %5136 = vmatpush3.bf16.msra.mxu1 %v4234_v13 }
 0x793   : > { %5154 = vmatpush3.bf16.msra.mxu0 %v5595_v47 }
 0x794   : > { %5155 = vmatprep.subr.bf16.mxu0 %v5662_v11  ;;  %v4297_v11 = vld [vmem:[%s7606_s19] sm:$0x1] }
 0x797   : > { %5156 = vmatpush3.bf16.msra.mxu0 %v5596_v48 }
 0x843   : > { %v3978_v34 = vpop.f32.mrb[52].mxu1 }
 0x844   : > { %v3984_v50 = vadd.f32 %v3978_v34, %v7457_v27  ;;  %v5091_v35 = vpop.f32.mrb[53].mxu1 }
 0x845   : > { %v3981_v54 = vpop.f32.mrb[54].mxu1 }
 0x846   : > { %v5092_v36 = vpop.f32.mrb[55].mxu1 }
 0x84b   : > { %v4124_v38 = vpop.f32.mrb[56].mxu0  ;;  %v4170_v39 = vpop.f32.mrb[56].mxu1 }
 0x84c   : > { %v4130_v40 = vadd.f32 %v4124_v38, %v3984_v50  ;;  %v4176_v41 = vpack.c.bf16 %v4170_v39, %v4170_v39  ;;  %v5121_v42 = vpop.f32.mrb[57].mxu1  ;;  %v5115_v43 = vpop.f32.mrb[57].mxu0 }
 0x84d   : > { %v4173_v44 = vpop.f32.mrb[58].mxu1  ;;  %v4127_v45 = vpop.f32.mrb[58].mxu0 }
 0x84e   : > { %5138 = vmatmul.mubr.msk.bf16.vlgmr.msra.gmra.mrb[60].mxu1 %vm3707_vm11, %v4176_v41  ;;  %v5122_v46 = vpop.f32.mrb[59].mxu1  ;;  %v5116_v49 = vpop.f32.mrb[59].mxu0 }
 0x921   : > { %v4270_v51 = vpop.f32.mrb[60].mxu1 }
 0x922   : > { %v4276_v53 = vadd.f32 %v4270_v51, %v4130_v40  ;;  %v5139_v56 = vpop.f32.mrb[61].mxu1 }
 0x923   : > { %v4273_v57 = vpop.f32.mrb[62].mxu1 }
 0x924   : > { %v4278_v58 = vadd.f32 %v4277_v52, %v4276_v53  ;;  %v5140_v59 = vpop.f32.mrb[63].mxu1 }
 0x926   : > { %v4279_v60 = vmax.f32 %v4278_v58, 0.0 }
 0x928   : > { %v4280_v61 = vpack.c.bf16 %v4279_v60, %v4279_v60 }
 0x92a   : > { %5158 = vmatmul.mubr.bf16.vlgmr.msra.gmra.mrb[60].mxu0 %v4280_v61 }
 0x9fd   : > { %v4380_v1 = vpop.f32.mrb[60].mxu0 }
 0x9fe   : > { %v4381_v62 = vadd.f32 %v4380_v1, %v4297_v11  ;;  %v5159_v63 = vpop.f32.mrb[61].mxu0 }
 0x9ff   : > { %v4383_v0 = vpop.f32.mrb[62].mxu0 }
 0xa00   : > { %4386 = vst [vmem:[%s666_s26] sm:$0x1] %v4381_v62  ;;  %v5160_v2 = vpop.f32.mrb[63].mxu0 }
 0xa01   : > { %5610 = shalt.err (!%p5607_p3)
}
 0xa02   : > { %s5611_s0 = scalar_lea.hbm %s7545_s28, 16  ;;  %s5615_s24 = scalar_lea.hbm %s7607_s20, 32 }
 0xa03   : > { %p5612_p4 = scmp.ne.s32.totalorder %s7545_s28, %s5611_s0  ;;  %p5616_p9 = scmp.lt.u32.totalorder %s7545_s28, %s7607_s20 }
 0xa04   : > { %p5617_p10 = scmp.lt.u32.totalorder %s5615_s24, %s5611_s0  ;;  %p5619_p12 = scmp.lt.u32.totalorder %s5611_s0, %s7545_s28 }
 0xa05   : > { %p5613_p7 = pnand %p5612_p4, %p5808_p5 }
 0xa06   : > { %p5618_p11 = por %p5617_p10, %p5616_p9 }
 0xa07   : > { %p5614_p8 = pneg %p5613_p7 }
 0xa08   : > { %p5620_p13 = por %p5619_p12, %p5618_p11 }
 0xa0a   : > { %p5621_p0 = pnand %p5620_p13, %p5614_p8 }
 0xa0c   : > { %5624 = shalt.err (!%p5621_p0)
}
 0xa0d   : > { %5207 = dma.vmem_to_hbm [thread:$0]  (%p5808_p5), %s7547_s1, 16, %s7545_s28, %s4388_s23  }
 0xa0e PF: > { %s7633_s2 = sld [smem:[#allocation7_spill]]  ;;  %s7634_s29 = sld [smem:[#allocation5_spill]] }
 0xa14   : > { %p5213_p1 = scmp.ge.s32.totalorder %s7633_s2, 2  ;;  %s4412_s30 = sand.u32 1, %s7634_s29  }
 0xa15   : > { %s4413_s26 = scalar_lea.sflag [#allocation3], %s4412_s30 }
 0xa16   : > { %p5210_p2 = pnand %p5213_p1, %p5812_p6 }
 0xa18   : > { %5642 = dma.done.wait (!%p5210_p2), %s4413_s26, 16  }
 0xa19   : > { %5644 = vsyncadd (!%p5210_p2), %s4413_s26, 4294967280  ;;  %s7636_s24 = sld [smem:[#allocation8_spill]]  ;;  %s7637_s0 = sld [smem:[#allocation6_spill]] }
 0xa1a   : > { %s7638_s23 = sld [smem:[#allocation9_spill]]  ;;  %s7639_s1 = smov %s5651_s22 }
 0xa1f   : > { %p30_p3 = scmp.ge.s32.totalorder %s7636_s24, 4   ;;  %s7640_s22 = smov %s7637_s0 }
 0xa21   :  { %32 = sbr.rel (!%p30_p3) target bundleno = 9 (0x9), region = 156 }
 0xa28   :  { %4417 = vsyncpa [#allocation3], 1 }
 0xa29   :  { %4419 = vsyncpa [#allocation3 + $0x1], 1 }

</bundles_post_ra>
